<compile_context>
chip_gen: v7x
topology: tpu7x:2x2x1
jax: 0.10.0
libtpu: 0.0.40
codegen_flags: <defaults>
</compile_context>

<pallas_src>
import math
import numpy as np
import jax
import jax.numpy as jnp
from jax.experimental import pallas as pl
from jax.experimental.pallas import tpu as pltpu

J = 17                      # num_joints (Human3.6M skeleton), hard-coded in the module
_INV_SQRT2 = np.float32(0.7071067811865476)
_LN_EPS = np.float32(1e-5)
_VPACK_W = 128              # lane width of the packed small-vector slab


# ---------------------------------------------------------------------------
# Deterministic adjacency (stand-in for adj_mx_from_skeleton())
# ---------------------------------------------------------------------------
def build_adj_17():
    # H36M 17-joint tree, symmetric adjacency + self loops, row-normalized D^-1 (A + I).
    parents = [-1, 0, 1, 2, 0, 4, 5, 0, 7, 8, 9, 8, 11, 12, 8, 14, 15]
    A = np.zeros((J, J), dtype=np.float32)
    for j, p in enumerate(parents):
        if p >= 0:
            A[j, p] = 1.0
            A[p, j] = 1.0
    A = A + np.eye(J, dtype=np.float32)
    A = A / A.sum(axis=1, keepdims=True)
    return jnp.asarray(A)


def _gelu_exact(x):
    # nn.GELU() default (erf-based, approximate='none')
    return 0.5 * x * (1.0 + jax.lax.erf(x * _INV_SQRT2))


# ---------------------------------------------------------------------------
# Fused forward kernel (everything resident in VMEM within one grid step)
# ---------------------------------------------------------------------------
def _make_fused_kernel(num_layer, inter_dim, in_dim, out_ch, out_pad):
    L = num_layer
    ROW_LN1G, ROW_LN1B, ROW_FEATB, ROW_B1 = 0, 1, 2, 3
    ROW_BFIN = 4 + 3 * L
    ROW_SEL = ROW_BFIN + 1

    def _ln(x, g, b):
        mu = jnp.mean(x, axis=-1, keepdims=True)
        var = jnp.mean((x - mu) ** 2, axis=-1, keepdims=True)
        return (x - mu) * jax.lax.rsqrt(var + _LN_EPS) * g + b

    def _mgc(x, w, md, m, bias, a_ref, cout):
        # ModulatedGraphConv with merged W = [W0 | W1] and diag(A) folded into M
        # (md = diag(A)*M, exact):  out = md*h0 + (A*(1-I)) @ (M*h1) + bias
        h = jnp.dot(x, w, preferred_element_type=jnp.float32)          # (R, 2*cout)
        h0 = h[:, :cout]
        h1 = h[:, cout:2 * cout]
        out = md * h0
        out = out + jnp.dot(a_ref[...], m * h1, preferred_element_type=jnp.float32)
        return out + bias

    def kernel(x_ref, fw_ref, a_ref, wp_ref, mp_ref, vp_ref, out_ref, slab_ref):
        # --- feature extractor stub (PoseTransformer stand-in) ---
        # TODO(synk): PoseTransformer source not provided; deterministic per-joint
        # linear projection keeping the (B, 1, J, hidden*num_proposals) output contract.
        feat = (jnp.dot(x_ref[...], fw_ref[...], preferred_element_type=jnp.float32)
                + vp_ref[ROW_FEATB:ROW_FEATB + 1, :in_dim])             # (R, 120)

        # --- DenseGCN: norm_gcn1 -> gcn1 -> GELU ---
        xg = _gelu_exact(_mgc(
            _ln(feat, vp_ref[ROW_LN1G:ROW_LN1G + 1, :in_dim],
                vp_ref[ROW_LN1B:ROW_LN1B + 1, :in_dim]),
            wp_ref[0:in_dim, :2 * inter_dim],
            mp_ref[:, 0:inter_dim], mp_ref[:, inter_dim:2 * inter_dim],
            vp_ref[ROW_B1:ROW_B1 + 1, :inter_dim], a_ref, inter_dim))
        slab_ref[:, 0:inter_dim] = xg                                   # dense-connection slab

        w_off = in_dim
        m_off = 2 * inter_dim
        for i in range(L):                                              # static unroll
            cin = inter_dim * (1 + i)
            base = 4 + 3 * i
            y = _gelu_exact(_mgc(
                _ln(slab_ref[:, 0:cin],
                    vp_ref[base:base + 1, :cin], vp_ref[base + 1:base + 2, :cin]),
                wp_ref[w_off:w_off + cin, :2 * inter_dim],
                mp_ref[:, m_off:m_off + inter_dim],
                mp_ref[:, m_off + inter_dim:m_off + 2 * inter_dim],
                vp_ref[base + 2:base + 3, :inter_dim], a_ref, inter_dim))
            slab_ref[:, cin:cin + inter_dim] = y                        # torch.cat along lanes
            w_off += cin
            m_off += 2 * inter_dim

        # --- gcn_final (no LN / GELU) ---
        cin = inter_dim * (L + 1)
        out3 = _mgc(slab_ref[...],
                    wp_ref[w_off:w_off + cin, :2 * out_ch],
                    mp_ref[:, m_off:m_off + out_ch],
                    mp_ref[:, m_off + out_ch:m_off + 2 * out_ch],
                    vp_ref[ROW_BFIN:ROW_BFIN + 1, :out_ch], a_ref, out_ch)

        # Lane-dense output: scatter out_ch lanes into a 128-lane slab with a tiny
        # selector matmul (rows [I_out | 0] live in v_pack) -> unmasked vst writeback.
        sel = vp_ref[ROW_SEL:ROW_SEL + out_ch, :out_pad]
        out_ref[...] = jnp.dot(out3, sel, preferred_element_type=jnp.float32)

    return kernel


# ---------------------------------------------------------------------------
# Deterministic parameter init (shapes follow the PyTorch __init__)
# ---------------------------------------------------------------------------
def _uniform(key, shape, lim):
    return jax.random.uniform(key, shape, jnp.float32, -lim, lim)


def init_mgc(key, Cin, Cout):
    k1, k2, k3 = jax.random.split(key, 3)
    lim_w = 1.414 * math.sqrt(6.0 / (Cin * Cout + 2 * Cout))   # xavier_uniform(gain=1.414)
    W = _uniform(k1, (2, Cin, Cout), lim_w)
    lim_m = 1.414 * math.sqrt(6.0 / (J + Cout))
    M = _uniform(k2, (J, Cout), lim_m)
    stdv = 1.0 / math.sqrt(Cout)
    bias = _uniform(k3, (Cout,), stdv)
    return dict(Wcat=jnp.concatenate([W[0], W[1]], axis=1),    # merged (Cin, 2*Cout)
                M=M, bias=bias)


def init_fusionnet_params(key, *, hidden, num_proposals, out_chanel, inter_dim, num_layer):
    adj = build_adj_17()
    in_dim = hidden * num_proposals
    assert in_dim == 120, "DenseGCN hard-codes LayerNorm(120): hidden*num_proposals must be 120"
    keys = jax.random.split(key, 4 + num_layer)
    params = {}
    # PoseTransformer stand-in
    params["feat_W"] = _uniform(keys[0], (3, hidden), 1.0 / math.sqrt(3.0))
    params["feat_b"] = jnp.zeros((hidden,), jnp.float32)
    # DenseGCN
    params["ln1_g"] = jnp.ones((in_dim,), jnp.float32)          # norm_gcn1 = LayerNorm(120)
    params["ln1_b"] = jnp.zeros((in_dim,), jnp.float32)
    params["gcn1"] = init_mgc(keys[1], in_dim, inter_dim)
    layers = []
    for i in range(num_layer):
        cin = inter_dim * (1 + i)
        layers.append(dict(ln_g=jnp.ones((cin,), jnp.float32),
                           ln_b=jnp.zeros((cin,), jnp.float32),
                           mgc=init_mgc(keys[2 + i], cin, inter_dim)))
    params["gcn_layers"] = layers
    params["gcn_final"] = init_mgc(keys[2 + num_layer], inter_dim * (num_layer + 1), out_chanel)
    # Adjacency preprocessing shared by EVERY ModulatedGraphConv: adj2 is the same
    # constant (1e-6) in each layer at init, so diag(A)/off-diag(A) are bit-identical
    # and deduplicated here.  (If adj2 were trained per layer, move this back per-layer.)
    A = adj + jnp.full((J, J), 1e-6, jnp.float32)
    A = (A.T + A) / 2.0
    params["adj_d"] = jnp.diag(A).reshape(J, 1)
    params["adj_off"] = A * (1.0 - jnp.eye(J, dtype=jnp.float32))
    return params


# ---------------------------------------------------------------------------
# FusionNet forward (single fused pallas_call, batch-tiled grid)
# ---------------------------------------------------------------------------
def fusionnet_forward(params, x, *, out_chanel, tile_b=None):
    B, P, F, nj, C = x.shape
    assert nj == J and C == 3
    assert F == 1, "FusionNet final reshape (and DenseGCN reshape(-1, 17*3)) requires num_frame == 1"
    hidden = params["feat_W"].shape[1]
    in_dim = hidden * P
    inter = params["gcn1"]["Wcat"].shape[1] // 2
    num_layer = len(params["gcn_layers"])
    out_pad = _VPACK_W
    assert in_dim <= _VPACK_W and inter * num_layer <= _VPACK_W
    assert 2 * out_chanel <= 2 * inter

    # --- batch tiling: grid over whole samples; A built once at TILE size ---
    if tile_b is None:
        tile_b = B if B <= 16 else 16        # ~272 rows/step fills v6e/v7x MXU rows
    n_tiles = -(-B // tile_b)
    B_pad = n_tiles * tile_b
    if n_tiles > 1:
        assert (tile_b * J) % 8 == 0, "multi-tile grids need 8-aligned row tiles"
    Rt = tile_b * J

    # one row per (sample, joint); lanes = [p0_xyz | p1_xyz | ...]
    x_rows = jnp.transpose(x[:, :, 0], (0, 2, 1, 3)).reshape(B * J, P * C)
    if B_pad != B:
        x_rows = jnp.pad(x_rows, ((0, (B_pad - B) * J), (0, 0)))

    # feature projection: block-diagonal => proposal concat happens inside the matmul
    Wbig = jnp.kron(jnp.eye(P, dtype=jnp.float32), params["feat_W"])     # (P*3, P*hidden)

    # shared adjacency (deduplicated; O(tile_b^2), resident across grid steps)
    A_blk = jnp.kron(jnp.eye(tile_b, dtype=jnp.float32), params["adj_off"])   # (Rt, Rt)
    d = params["adj_d"]

    # --- pack weights / modulations / small vectors into few operands ---
    mgcs = [params["gcn1"]] + [lp["mgc"] for lp in params["gcn_layers"]] + [params["gcn_final"]]
    w_rows, m_cols = [], []
    for mgc in mgcs:
        wc = mgc["Wcat"]
        if wc.shape[1] < 2 * inter:                                      # pad final Wcat lanes
            wc = jnp.pad(wc, ((0, 0), (0, 2 * inter - wc.shape[1])))
        w_rows.append(wc)
        m_cols += [jnp.tile(d * mgc["M"], (tile_b, 1)),                  # Md = diag(A)*M folded
                   jnp.tile(mgc["M"], (tile_b, 1))]
    w_pack = jnp.concatenate(w_rows, axis=0)                             # (sum_cin, 2*inter)
    m_pack = jnp.concatenate(m_cols, axis=1)                             # (Rt, 2*inter*(L+1)+2*out)

    def vrow(v):
        v = jnp.asarray(v, jnp.float32).reshape(1, -1)
        return jnp.pad(v, ((0, 0), (0, _VPACK_W - v.shape[1])))
    v_rows = [vrow(params["ln1_g"]), vrow(params["ln1_b"]),
              vrow(jnp.tile(params["feat_b"], (P,))), vrow(params["gcn1"]["bias"])]
    for lp in params["gcn_layers"]:
        v_rows += [vrow(lp["ln_g"]), vrow(lp["ln_b"]), vrow(lp["mgc"]["bias"])]
    v_rows.append(vrow(params["gcn_final"]["bias"]))
    v_rows.append(jnp.pad(jnp.eye(out_chanel, dtype=jnp.float32),
                          ((0, 0), (0, _VPACK_W - out_chanel))))         # output selector rows
    v_pack = jnp.concatenate(v_rows, axis=0)                             # (5+3L+out, 128)

    def const(arr):
        return pl.BlockSpec(arr.shape, lambda b: (0, 0))                 # resident across steps

    kernel = _make_fused_kernel(num_layer, inter, in_dim, out_chanel, out_pad)
    out = pl.pallas_call(
        kernel,
        out_shape=jax.ShapeDtypeStruct((B_pad * J, out_pad), jnp.float32),
        grid=(n_tiles,),
        in_specs=[pl.BlockSpec((Rt, P * C), lambda b: (b, 0)),
                  const(Wbig), const(A_blk), const(w_pack), const(m_pack), const(v_pack)],
        out_specs=pl.BlockSpec((Rt, out_pad), lambda b: (b, 0)),
        scratch_shapes=[pltpu.VMEM((Rt, inter * (num_layer + 1)), jnp.float32)],
        compiler_params=pltpu.CompilerParams(
            dimension_semantics=("parallel",),        # shard batch tiles across TCs on v7x
            vmem_limit_bytes=32 * 1024 * 1024),       # explicit budget, safe on v5e/v6e/v7x
    )(x_rows, Wbig, A_blk, w_pack, m_pack, v_pack)

    out = out[:B * J, :out_chanel]                    # strip lane padding / batch padding
    out = out.reshape(-1, J * out_chanel)             # DenseGCN: reshape(-1, 17*3)
    return out.reshape(B, F, nj, out_chanel)          # FusionNet final reshape


# ---------------------------------------------------------------------------
if __name__ == "__main__":
    key = jax.random.PRNGKey(0)
    B, num_proposals, num_frame, num_joints = 2, 3, 1, 17
    hidden_chanel, out_chanel = 40, 3                 # 40*3 = 120 matches LayerNorm(120)

    pkey, xkey = jax.random.split(key)
    params = init_fusionnet_params(pkey, hidden=hidden_chanel, num_proposals=num_proposals,
                                   out_chanel=out_chanel, inter_dim=32, num_layer=2)
    x = jax.random.normal(xkey, (B, num_proposals, num_frame, num_joints, 3), jnp.float32)

    fwd = jax.jit(lambda p, xx: fusionnet_forward(p, xx, out_chanel=out_chanel))
    out = jax.block_until_ready(fwd(params, x))

    assert out.shape == (B, num_frame, num_joints, out_chanel), out.shape
    assert bool(jnp.all(jnp.isfinite(out)))
    print("KERNEL_OK")
</pallas_src>

<mosaic_0001>
module attributes {stable_mosaic.version = 11 : i64} {
  func.func @kernel(%arg0: i32, %arg1: memref<34x9xf32, #tpu.memory_space<vmem>>, %arg2: memref<9x120xf32, #tpu.memory_space<vmem>>, %arg3: memref<34x34xf32, #tpu.memory_space<vmem>>, %arg4: memref<312x64xf32, #tpu.memory_space<vmem>>, %arg5: memref<34x198xf32, #tpu.memory_space<vmem>>, %arg6: memref<14x128xf32, #tpu.memory_space<vmem>>, %arg7: memref<34x128xf32, #tpu.memory_space<vmem>>, %arg8: memref<34x96xf32, #tpu.memory_space<vmem>>) attributes {dimension_semantics = [#tpu.dimension_semantics<parallel>], iteration_bounds = array<i64: 1>, scalar_prefetch = 0 : i64, scratch_operands = 1 : i64, tpu.core_type = #tpu.core_type<tc>, window_params = [{transform_indices = @transform_0, window_bounds = array<i64: 34, 9>}, {pipeline_mode = #tpu.pipeline_mode<synchronous>, transform_indices = @transform_1, window_bounds = array<i64: 9, 120>}, {pipeline_mode = #tpu.pipeline_mode<synchronous>, transform_indices = @transform_2, window_bounds = array<i64: 34, 34>}, {pipeline_mode = #tpu.pipeline_mode<synchronous>, transform_indices = @transform_3, window_bounds = array<i64: 312, 64>}, {pipeline_mode = #tpu.pipeline_mode<synchronous>, transform_indices = @transform_4, window_bounds = array<i64: 34, 198>}, {pipeline_mode = #tpu.pipeline_mode<synchronous>, transform_indices = @transform_5, window_bounds = array<i64: 14, 128>}, {transform_indices = @transform_6, window_bounds = array<i64: 34, 128>}]} {
    %c0 = arith.constant 0 : index
    %c0_0 = arith.constant 0 : index
    %0 = vector.load %arg1[%c0, %c0_0] : memref<34x9xf32, #tpu.memory_space<vmem>>, vector<34x9xf32>
    %c0_1 = arith.constant 0 : index
    %c0_2 = arith.constant 0 : index
    %1 = vector.load %arg2[%c0_1, %c0_2] : memref<9x120xf32, #tpu.memory_space<vmem>>, vector<9x120xf32>
    %cst = arith.constant dense<0.000000e+00> : vector<34x120xf32>
    %2 = tpu.matmul %0, %1, %cst {dimension_numbers = #tpu.dot_dimension_numbers<[1], [0], [0], [1], [0, 0, 1, 1], [], []>} : vector<34x9xf32>, vector<9x120xf32>, vector<34x120xf32> -> vector<34x120xf32>
    %c2 = arith.constant 2 : index
    %c0_3 = arith.constant 0 : index
    %3 = vector.load %arg6[%c2, %c0_3] : memref<14x128xf32, #tpu.memory_space<vmem>>, vector<1x120xf32>
    %4 = vector.broadcast %3 : vector<1x120xf32> to vector<34x120xf32>
    %5 = arith.addf %2, %4 : vector<34x120xf32>
    %c0_4 = arith.constant 0 : index
    %c0_5 = arith.constant 0 : index
    %6 = vector.load %arg6[%c0_4, %c0_5] : memref<14x128xf32, #tpu.memory_space<vmem>>, vector<1x120xf32>
    %c1 = arith.constant 1 : index
    %c0_6 = arith.constant 0 : index
    %7 = vector.load %arg6[%c1, %c0_6] : memref<14x128xf32, #tpu.memory_space<vmem>>, vector<1x120xf32>
    %cst_7 = arith.constant dense<0.000000e+00> : vector<34xf32>
    %8 = vector.multi_reduction <add>, %5, %cst_7 [1] : vector<34x120xf32> to vector<34xf32>
    %9 = vector.shape_cast %8 : vector<34xf32> to vector<34x1xf32>
    %cst_8 = arith.constant 1.200000e+02 : f32
    %10 = vector.broadcast %cst_8 : f32 to vector<34x1xf32>
    %11 = arith.divf %9, %10 : vector<34x1xf32>
    %12 = vector.broadcast %11 : vector<34x1xf32> to vector<34x120xf32>
    %13 = arith.subf %5, %12 : vector<34x120xf32>
    %14 = arith.mulf %13, %13 : vector<34x120xf32>
    %cst_9 = arith.constant dense<0.000000e+00> : vector<34xf32>
    %15 = vector.multi_reduction <add>, %14, %cst_9 [1] : vector<34x120xf32> to vector<34xf32>
    %16 = vector.shape_cast %15 : vector<34xf32> to vector<34x1xf32>
    %cst_10 = arith.constant 1.200000e+02 : f32
    %17 = vector.broadcast %cst_10 : f32 to vector<34x1xf32>
    %18 = arith.divf %16, %17 : vector<34x1xf32>
    %19 = vector.broadcast %11 : vector<34x1xf32> to vector<34x120xf32>
    %20 = arith.subf %5, %19 : vector<34x120xf32>
    %cst_11 = arith.constant 9.99999974E-6 : f32
    %21 = vector.broadcast %cst_11 : f32 to vector<34x1xf32>
    %22 = arith.addf %18, %21 : vector<34x1xf32>
    %23 = math.rsqrt %22 : vector<34x1xf32>
    %24 = vector.broadcast %23 : vector<34x1xf32> to vector<34x120xf32>
    %25 = arith.mulf %20, %24 : vector<34x120xf32>
    %26 = vector.broadcast %6 : vector<1x120xf32> to vector<34x120xf32>
    %27 = arith.mulf %25, %26 : vector<34x120xf32>
    %28 = vector.broadcast %7 : vector<1x120xf32> to vector<34x120xf32>
    %29 = arith.addf %27, %28 : vector<34x120xf32>
    %c0_12 = arith.constant 0 : index
    %c0_13 = arith.constant 0 : index
    %30 = vector.load %arg4[%c0_12, %c0_13] : memref<312x64xf32, #tpu.memory_space<vmem>>, vector<120x64xf32>
    %c0_14 = arith.constant 0 : index
    %c0_15 = arith.constant 0 : index
    %31 = vector.load %arg5[%c0_14, %c0_15] : memref<34x198xf32, #tpu.memory_space<vmem>>, vector<34x32xf32>
    %c0_16 = arith.constant 0 : index
    %c32 = arith.constant 32 : index
    %32 = vector.load %arg5[%c0_16, %c32] : memref<34x198xf32, #tpu.memory_space<vmem>>, vector<34x32xf32>
    %c3 = arith.constant 3 : index
    %c0_17 = arith.constant 0 : index
    %33 = vector.load %arg6[%c3, %c0_17] : memref<14x128xf32, #tpu.memory_space<vmem>>, vector<1x32xf32>
    %cst_18 = arith.constant dense<0.000000e+00> : vector<34x64xf32>
    %34 = tpu.matmul %29, %30, %cst_18 {dimension_numbers = #tpu.dot_dimension_numbers<[1], [0], [0], [1], [0, 0, 1, 1], [], []>} : vector<34x120xf32>, vector<120x64xf32>, vector<34x64xf32> -> vector<34x64xf32>
    %35 = vector.extract_strided_slice %34 {offsets = [0, 0], sizes = [34, 32], strides = [1, 1]} : vector<34x64xf32> to vector<34x32xf32>
    %36 = vector.extract_strided_slice %34 {offsets = [0, 32], sizes = [34, 32], strides = [1, 1]} : vector<34x64xf32> to vector<34x32xf32>
    %37 = arith.mulf %31, %35 : vector<34x32xf32>
    %c0_19 = arith.constant 0 : index
    %c0_20 = arith.constant 0 : index
    %38 = vector.load %arg3[%c0_19, %c0_20] : memref<34x34xf32, #tpu.memory_space<vmem>>, vector<34x34xf32>
    %39 = arith.mulf %32, %36 : vector<34x32xf32>
    %cst_21 = arith.constant dense<0.000000e+00> : vector<34x32xf32>
    %40 = tpu.matmul %38, %39, %cst_21 {dimension_numbers = #tpu.dot_dimension_numbers<[1], [0], [0], [1], [0, 0, 1, 1], [], []>} : vector<34x34xf32>, vector<34x32xf32>, vector<34x32xf32> -> vector<34x32xf32>
    %41 = arith.addf %37, %40 : vector<34x32xf32>
    %42 = vector.broadcast %33 : vector<1x32xf32> to vector<34x32xf32>
    %43 = arith.addf %41, %42 : vector<34x32xf32>
    %cst_22 = arith.constant 5.000000e-01 : f32
    %44 = vector.broadcast %cst_22 : f32 to vector<34x32xf32>
    %45 = arith.mulf %44, %43 : vector<34x32xf32>
    %cst_23 = arith.constant 0.707106769 : f32
    %46 = vector.broadcast %cst_23 : f32 to vector<34x32xf32>
    %47 = arith.mulf %43, %46 : vector<34x32xf32>
    %48 = math.erf %47 : vector<34x32xf32>
    %cst_24 = arith.constant 1.000000e+00 : f32
    %49 = vector.broadcast %cst_24 : f32 to vector<34x32xf32>
    %50 = arith.addf %49, %48 : vector<34x32xf32>
    %51 = arith.mulf %45, %50 : vector<34x32xf32>
    %c0_25 = arith.constant 0 : index
    %c0_26 = arith.constant 0 : index
    %52 = vector.load %arg8[%c0_25, %c0_26] : memref<34x96xf32, #tpu.memory_space<vmem>>, vector<34x32xf32>
    tpu.vector_store %arg8[%c0_25, %c0_26], %51 {strides = array<i32>} : memref<34x96xf32, #tpu.memory_space<vmem>>, vector<34x32xf32>,
    %c0_27 = arith.constant 0 : index
    %c0_28 = arith.constant 0 : index
    %53 = vector.load %arg8[%c0_27, %c0_28] : memref<34x96xf32, #tpu.memory_space<vmem>>, vector<34x32xf32>
    %c4 = arith.constant 4 : index
    %c0_29 = arith.constant 0 : index
    %54 = vector.load %arg6[%c4, %c0_29] : memref<14x128xf32, #tpu.memory_space<vmem>>, vector<1x32xf32>
    %c5 = arith.constant 5 : index
    %c0_30 = arith.constant 0 : index
    %55 = vector.load %arg6[%c5, %c0_30] : memref<14x128xf32, #tpu.memory_space<vmem>>, vector<1x32xf32>
    %cst_31 = arith.constant dense<0.000000e+00> : vector<34xf32>
    %56 = vector.multi_reduction <add>, %53, %cst_31 [1] : vector<34x32xf32> to vector<34xf32>
    %57 = vector.shape_cast %56 : vector<34xf32> to vector<34x1xf32>
    %cst_32 = arith.constant 3.200000e+01 : f32
    %58 = vector.broadcast %cst_32 : f32 to vector<34x1xf32>
    %59 = arith.divf %57, %58 : vector<34x1xf32>
    %60 = vector.broadcast %59 : vector<34x1xf32> to vector<34x32xf32>
    %61 = arith.subf %53, %60 : vector<34x32xf32>
    %62 = arith.mulf %61, %61 : vector<34x32xf32>
    %cst_33 = arith.constant dense<0.000000e+00> : vector<34xf32>
    %63 = vector.multi_reduction <add>, %62, %cst_33 [1] : vector<34x32xf32> to vector<34xf32>
    %64 = vector.shape_cast %63 : vector<34xf32> to vector<34x1xf32>
    %cst_34 = arith.constant 3.200000e+01 : f32
    %65 = vector.broadcast %cst_34 : f32 to vector<34x1xf32>
    %66 = arith.divf %64, %65 : vector<34x1xf32>
    %67 = vector.broadcast %59 : vector<34x1xf32> to vector<34x32xf32>
    %68 = arith.subf %53, %67 : vector<34x32xf32>
    %cst_35 = arith.constant 9.99999974E-6 : f32
    %69 = vector.broadcast %cst_35 : f32 to vector<34x1xf32>
    %70 = arith.addf %66, %69 : vector<34x1xf32>
    %71 = math.rsqrt %70 : vector<34x1xf32>
    %72 = vector.broadcast %71 : vector<34x1xf32> to vector<34x32xf32>
    %73 = arith.mulf %68, %72 : vector<34x32xf32>
    %74 = vector.broadcast %54 : vector<1x32xf32> to vector<34x32xf32>
    %75 = arith.mulf %73, %74 : vector<34x32xf32>
    %76 = vector.broadcast %55 : vector<1x32xf32> to vector<34x32xf32>
    %77 = arith.addf %75, %76 : vector<34x32xf32>
    %c120 = arith.constant 120 : index
    %c0_36 = arith.constant 0 : index
    %78 = vector.load %arg4[%c120, %c0_36] : memref<312x64xf32, #tpu.memory_space<vmem>>, vector<32x64xf32>
    %c0_37 = arith.constant 0 : index
    %c64 = arith.constant 64 : index
    %79 = vector.load %arg5[%c0_37, %c64] : memref<34x198xf32, #tpu.memory_space<vmem>>, vector<34x32xf32>
    %c0_38 = arith.constant 0 : index
    %c96 = arith.constant 96 : index
    %80 = vector.load %arg5[%c0_38, %c96] : memref<34x198xf32, #tpu.memory_space<vmem>>, vector<34x32xf32>
    %c6 = arith.constant 6 : index
    %c0_39 = arith.constant 0 : index
    %81 = vector.load %arg6[%c6, %c0_39] : memref<14x128xf32, #tpu.memory_space<vmem>>, vector<1x32xf32>
    %cst_40 = arith.constant dense<0.000000e+00> : vector<34x64xf32>
    %82 = tpu.matmul %77, %78, %cst_40 {dimension_numbers = #tpu.dot_dimension_numbers<[1], [0], [0], [1], [0, 0, 1, 1], [], []>} : vector<34x32xf32>, vector<32x64xf32>, vector<34x64xf32> -> vector<34x64xf32>
    %83 = vector.extract_strided_slice %82 {offsets = [0, 0], sizes = [34, 32], strides = [1, 1]} : vector<34x64xf32> to vector<34x32xf32>
    %84 = vector.extract_strided_slice %82 {offsets = [0, 32], sizes = [34, 32], strides = [1, 1]} : vector<34x64xf32> to vector<34x32xf32>
    %85 = arith.mulf %79, %83 : vector<34x32xf32>
    %c0_41 = arith.constant 0 : index
    %c0_42 = arith.constant 0 : index
    %86 = vector.load %arg3[%c0_41, %c0_42] : memref<34x34xf32, #tpu.memory_space<vmem>>, vector<34x34xf32>
    %87 = arith.mulf %80, %84 : vector<34x32xf32>
    %cst_43 = arith.constant dense<0.000000e+00> : vector<34x32xf32>
    %88 = tpu.matmul %86, %87, %cst_43 {dimension_numbers = #tpu.dot_dimension_numbers<[1], [0], [0], [1], [0, 0, 1, 1], [], []>} : vector<34x34xf32>, vector<34x32xf32>, vector<34x32xf32> -> vector<34x32xf32>
    %89 = arith.addf %85, %88 : vector<34x32xf32>
    %90 = vector.broadcast %81 : vector<1x32xf32> to vector<34x32xf32>
    %91 = arith.addf %89, %90 : vector<34x32xf32>
    %cst_44 = arith.constant 5.000000e-01 : f32
    %92 = vector.broadcast %cst_44 : f32 to vector<34x32xf32>
    %93 = arith.mulf %92, %91 : vector<34x32xf32>
    %cst_45 = arith.constant 0.707106769 : f32
    %94 = vector.broadcast %cst_45 : f32 to vector<34x32xf32>
    %95 = arith.mulf %91, %94 : vector<34x32xf32>
    %96 = math.erf %95 : vector<34x32xf32>
    %cst_46 = arith.constant 1.000000e+00 : f32
    %97 = vector.broadcast %cst_46 : f32 to vector<34x32xf32>
    %98 = arith.addf %97, %96 : vector<34x32xf32>
    %99 = arith.mulf %93, %98 : vector<34x32xf32>
    %c0_47 = arith.constant 0 : index
    %c32_48 = arith.constant 32 : index
    %100 = vector.load %arg8[%c0_47, %c32_48] : memref<34x96xf32, #tpu.memory_space<vmem>>, vector<34x32xf32>
    tpu.vector_store %arg8[%c0_47, %c32_48], %99 {strides = array<i32>} : memref<34x96xf32, #tpu.memory_space<vmem>>, vector<34x32xf32>,
    %c0_49 = arith.constant 0 : index
    %c0_50 = arith.constant 0 : index
    %101 = vector.load %arg8[%c0_49, %c0_50] : memref<34x96xf32, #tpu.memory_space<vmem>>, vector<34x64xf32>
    %c7 = arith.constant 7 : index
    %c0_51 = arith.constant 0 : index
    %102 = vector.load %arg6[%c7, %c0_51] : memref<14x128xf32, #tpu.memory_space<vmem>>, vector<1x64xf32>
    %c8 = arith.constant 8 : index
    %c0_52 = arith.constant 0 : index
    %103 = vector.load %arg6[%c8, %c0_52] : memref<14x128xf32, #tpu.memory_space<vmem>>, vector<1x64xf32>
    %cst_53 = arith.constant dense<0.000000e+00> : vector<34xf32>
    %104 = vector.multi_reduction <add>, %101, %cst_53 [1] : vector<34x64xf32> to vector<34xf32>
    %105 = vector.shape_cast %104 : vector<34xf32> to vector<34x1xf32>
    %cst_54 = arith.constant 6.400000e+01 : f32
    %106 = vector.broadcast %cst_54 : f32 to vector<34x1xf32>
    %107 = arith.divf %105, %106 : vector<34x1xf32>
    %108 = vector.broadcast %107 : vector<34x1xf32> to vector<34x64xf32>
    %109 = arith.subf %101, %108 : vector<34x64xf32>
    %110 = arith.mulf %109, %109 : vector<34x64xf32>
    %cst_55 = arith.constant dense<0.000000e+00> : vector<34xf32>
    %111 = vector.multi_reduction <add>, %110, %cst_55 [1] : vector<34x64xf32> to vector<34xf32>
    %112 = vector.shape_cast %111 : vector<34xf32> to vector<34x1xf32>
    %cst_56 = arith.constant 6.400000e+01 : f32
    %113 = vector.broadcast %cst_56 : f32 to vector<34x1xf32>
    %114 = arith.divf %112, %113 : vector<34x1xf32>
    %115 = vector.broadcast %107 : vector<34x1xf32> to vector<34x64xf32>
    %116 = arith.subf %101, %115 : vector<34x64xf32>
    %cst_57 = arith.constant 9.99999974E-6 : f32
    %117 = vector.broadcast %cst_57 : f32 to vector<34x1xf32>
    %118 = arith.addf %114, %117 : vector<34x1xf32>
    %119 = math.rsqrt %118 : vector<34x1xf32>
    %120 = vector.broadcast %119 : vector<34x1xf32> to vector<34x64xf32>
    %121 = arith.mulf %116, %120 : vector<34x64xf32>
    %122 = vector.broadcast %102 : vector<1x64xf32> to vector<34x64xf32>
    %123 = arith.mulf %121, %122 : vector<34x64xf32>
    %124 = vector.broadcast %103 : vector<1x64xf32> to vector<34x64xf32>
    %125 = arith.addf %123, %124 : vector<34x64xf32>
    %c152 = arith.constant 152 : index
    %c0_58 = arith.constant 0 : index
    %126 = vector.load %arg4[%c152, %c0_58] : memref<312x64xf32, #tpu.memory_space<vmem>>, vector<64x64xf32>
    %c0_59 = arith.constant 0 : index
    %c128 = arith.constant 128 : index
    %127 = vector.load %arg5[%c0_59, %c128] : memref<34x198xf32, #tpu.memory_space<vmem>>, vector<34x32xf32>
    %c0_60 = arith.constant 0 : index
    %c160 = arith.constant 160 : index
    %128 = vector.load %arg5[%c0_60, %c160] : memref<34x198xf32, #tpu.memory_space<vmem>>, vector<34x32xf32>
    %c9 = arith.constant 9 : index
    %c0_61 = arith.constant 0 : index
    %129 = vector.load %arg6[%c9, %c0_61] : memref<14x128xf32, #tpu.memory_space<vmem>>, vector<1x32xf32>
    %cst_62 = arith.constant dense<0.000000e+00> : vector<34x64xf32>
    %130 = tpu.matmul %125, %126, %cst_62 {dimension_numbers = #tpu.dot_dimension_numbers<[1], [0], [0], [1], [0, 0, 1, 1], [], []>} : vector<34x64xf32>, vector<64x64xf32>, vector<34x64xf32> -> vector<34x64xf32>
    %131 = vector.extract_strided_slice %130 {offsets = [0, 0], sizes = [34, 32], strides = [1, 1]} : vector<34x64xf32> to vector<34x32xf32>
    %132 = vector.extract_strided_slice %130 {offsets = [0, 32], sizes = [34, 32], strides = [1, 1]} : vector<34x64xf32> to vector<34x32xf32>
    %133 = arith.mulf %127, %131 : vector<34x32xf32>
    %c0_63 = arith.constant 0 : index
    %c0_64 = arith.constant 0 : index
    %134 = vector.load %arg3[%c0_63, %c0_64] : memref<34x34xf32, #tpu.memory_space<vmem>>, vector<34x34xf32>
    %135 = arith.mulf %128, %132 : vector<34x32xf32>
    %cst_65 = arith.constant dense<0.000000e+00> : vector<34x32xf32>
    %136 = tpu.matmul %134, %135, %cst_65 {dimension_numbers = #tpu.dot_dimension_numbers<[1], [0], [0], [1], [0, 0, 1, 1], [], []>} : vector<34x34xf32>, vector<34x32xf32>, vector<34x32xf32> -> vector<34x32xf32>
    %137 = arith.addf %133, %136 : vector<34x32xf32>
    %138 = vector.broadcast %129 : vector<1x32xf32> to vector<34x32xf32>
    %139 = arith.addf %137, %138 : vector<34x32xf32>
    %cst_66 = arith.constant 5.000000e-01 : f32
    %140 = vector.broadcast %cst_66 : f32 to vector<34x32xf32>
    %141 = arith.mulf %140, %139 : vector<34x32xf32>
    %cst_67 = arith.constant 0.707106769 : f32
    %142 = vector.broadcast %cst_67 : f32 to vector<34x32xf32>
    %143 = arith.mulf %139, %142 : vector<34x32xf32>
    %144 = math.erf %143 : vector<34x32xf32>
    %cst_68 = arith.constant 1.000000e+00 : f32
    %145 = vector.broadcast %cst_68 : f32 to vector<34x32xf32>
    %146 = arith.addf %145, %144 : vector<34x32xf32>
    %147 = arith.mulf %141, %146 : vector<34x32xf32>
    %c0_69 = arith.constant 0 : index
    %c64_70 = arith.constant 64 : index
    %148 = vector.load %arg8[%c0_69, %c64_70] : memref<34x96xf32, #tpu.memory_space<vmem>>, vector<34x32xf32>
    tpu.vector_store %arg8[%c0_69, %c64_70], %147 {strides = array<i32>} : memref<34x96xf32, #tpu.memory_space<vmem>>, vector<34x32xf32>,
    %c0_71 = arith.constant 0 : index
    %c0_72 = arith.constant 0 : index
    %149 = vector.load %arg8[%c0_71, %c0_72] : memref<34x96xf32, #tpu.memory_space<vmem>>, vector<34x96xf32>
    %c216 = arith.constant 216 : index
    %c0_73 = arith.constant 0 : index
    %150 = vector.load %arg4[%c216, %c0_73] : memref<312x64xf32, #tpu.memory_space<vmem>>, vector<96x6xf32>
    %c0_74 = arith.constant 0 : index
    %c192 = arith.constant 192 : index
    %151 = vector.load %arg5[%c0_74, %c192] : memref<34x198xf32, #tpu.memory_space<vmem>>, vector<34x3xf32>
    %c0_75 = arith.constant 0 : index
    %c195 = arith.constant 195 : index
    %152 = vector.load %arg5[%c0_75, %c195] : memref<34x198xf32, #tpu.memory_space<vmem>>, vector<34x3xf32>
    %c10 = arith.constant 10 : index
    %c0_76 = arith.constant 0 : index
    %153 = vector.load %arg6[%c10, %c0_76] : memref<14x128xf32, #tpu.memory_space<vmem>>, vector<1x3xf32>
    %cst_77 = arith.constant dense<0.000000e+00> : vector<34x6xf32>
    %154 = tpu.matmul %149, %150, %cst_77 {dimension_numbers = #tpu.dot_dimension_numbers<[1], [0], [0], [1], [0, 0, 1, 1], [], []>} : vector<34x96xf32>, vector<96x6xf32>, vector<34x6xf32> -> vector<34x6xf32>
    %155 = vector.extract_strided_slice %154 {offsets = [0, 0], sizes = [34, 3], strides = [1, 1]} : vector<34x6xf32> to vector<34x3xf32>
    %156 = vector.extract_strided_slice %154 {offsets = [0, 3], sizes = [34, 3], strides = [1, 1]} : vector<34x6xf32> to vector<34x3xf32>
    %157 = arith.mulf %151, %155 : vector<34x3xf32>
    %c0_78 = arith.constant 0 : index
    %c0_79 = arith.constant 0 : index
    %158 = vector.load %arg3[%c0_78, %c0_79] : memref<34x34xf32, #tpu.memory_space<vmem>>, vector<34x34xf32>
    %159 = arith.mulf %152, %156 : vector<34x3xf32>
    %cst_80 = arith.constant dense<0.000000e+00> : vector<34x3xf32>
    %160 = tpu.matmul %158, %159, %cst_80 {dimension_numbers = #tpu.dot_dimension_numbers<[1], [0], [0], [1], [0, 0, 1, 1], [], []>} : vector<34x34xf32>, vector<34x3xf32>, vector<34x3xf32> -> vector<34x3xf32>
    %161 = arith.addf %157, %160 : vector<34x3xf32>
    %162 = vector.broadcast %153 : vector<1x3xf32> to vector<34x3xf32>
    %163 = arith.addf %161, %162 : vector<34x3xf32>
    %c11 = arith.constant 11 : index
    %c0_81 = arith.constant 0 : index
    %164 = vector.load %arg6[%c11, %c0_81] : memref<14x128xf32, #tpu.memory_space<vmem>>, vector<3x128xf32>
    %cst_82 = arith.constant dense<0.000000e+00> : vector<34x128xf32>
    %165 = tpu.matmul %163, %164, %cst_82 {dimension_numbers = #tpu.dot_dimension_numbers<[1], [0], [0], [1], [0, 0, 1, 1], [], []>} : vector<34x3xf32>, vector<3x128xf32>, vector<34x128xf32> -> vector<34x128xf32>
    %c0_83 = arith.constant 0 : index
    %c0_84 = arith.constant 0 : index
    %166 = vector.load %arg7[%c0_83, %c0_84] : memref<34x128xf32, #tpu.memory_space<vmem>>, vector<34x128xf32>
    tpu.vector_store %arg7[%c0_83, %c0_84], %165 {strides = array<i32>} : memref<34x128xf32, #tpu.memory_space<vmem>>, vector<34x128xf32>,
    return
  }
  func.func @transform_0(%arg0: i32) -> (i32, i32) {
    %c0_i32 = arith.constant 0 : i32
    %c0_i32_0 = arith.constant 0 : i32
    return %arg0, %c0_i32 : i32, i32
  }
  func.func @transform_1(%arg0: i32) -> (i32, i32) {
    %c0_i32 = arith.constant 0 : i32
    %c0_i32_0 = arith.constant 0 : i32
    %c0_i32_1 = arith.constant 0 : i32
    return %c0_i32, %c0_i32_0 : i32, i32
  }
  func.func @transform_2(%arg0: i32) -> (i32, i32) {
    %c0_i32 = arith.constant 0 : i32
    %c0_i32_0 = arith.constant 0 : i32
    %c0_i32_1 = arith.constant 0 : i32
    return %c0_i32, %c0_i32_0 : i32, i32
  }
  func.func @transform_3(%arg0: i32) -> (i32, i32) {
    %c0_i32 = arith.constant 0 : i32
    %c0_i32_0 = arith.constant 0 : i32
    %c0_i32_1 = arith.constant 0 : i32
    return %c0_i32, %c0_i32_0 : i32, i32
  }
  func.func @transform_4(%arg0: i32) -> (i32, i32) {
    %c0_i32 = arith.constant 0 : i32
    %c0_i32_0 = arith.constant 0 : i32
    %c0_i32_1 = arith.constant 0 : i32
    return %c0_i32, %c0_i32_0 : i32, i32
  }
  func.func @transform_5(%arg0: i32) -> (i32, i32) {
    %c0_i32 = arith.constant 0 : i32
    %c0_i32_0 = arith.constant 0 : i32
    %c0_i32_1 = arith.constant 0 : i32
    return %c0_i32, %c0_i32_0 : i32, i32
  }
  func.func @transform_6(%arg0: i32) -> (i32, i32) {
    %c0_i32 = arith.constant 0 : i32
    %c0_i32_0 = arith.constant 0 : i32
    return %arg0, %c0_i32 : i32, i32
  }
}

</mosaic_0001>

<bundles_post_ra>
// kernel: tile.49
= control target key start
LH: loop header
LB: loop body
LE: loop exit
PB: predicated region body
PF: predicated region fallthrough
CT: control target
= control target key end

     0   :  { %vm3_vm0 = vcmask 261120   ;;  %s11_s6 = smov 3  ;;  %s74_s0 = inlined_call_operand.vmem [shape: f32[2,17,32], index: 0, kind: input, shape index: {}]   ;;  %s75_s1 = inlined_call_operand.vmem [shape: f32[34,32], index: 1, kind: output, shape index: {}]  }
   0x1   :  { %v2_v0 = vld [vmem:[%s74_s0] sm:$0xff]   ;;  %v26_v1 = vld [vmem:[%s74_s0 + $0x8] sm:$0xff]  }
   0x2   :  { %v28_v2 = vld [vmem:[%s74_s0 + $0x10] ss:$8 sm:%s11_s6]   ;;  %4 = vst.msk [vmem:[%s75_s1] sm:$0xff] %vm3_vm0, %v2_v0   ;;  %27 = vst.msk [vmem:[%s75_s1 + $0x8] sm:$0xff] %vm3_vm0, %v26_v1  }
   0x3   :  { %29 = vst.msk [vmem:[%s75_s1 + $0x10] sm:$0x3] %vm3_vm0, %v28_v2   ;;  %v30_v3 = vld [vmem:[%s74_s0 + $0x19] sm:$0xff]   ;;  %v32_v4 = vld [vmem:[%s74_s0 + $0x21] sm:$0xff]  }
   0x4   :  { %31 = vst.msk [vmem:[%s75_s1 + $0x12] sm:$0xff] %vm3_vm0, %v30_v3   ;;  %33 = vst.msk [vmem:[%s75_s1 + $0x1a] sm:$0xff] %vm3_vm0, %v32_v4  }

// kernel: tile.79
= control target key start
LH: loop header
LB: loop body
LE: loop exit
PB: predicated region body
PF: predicated region fallthrough
CT: control target
= control target key end

     0   :  { %vm16_vm0 = vcmask 138240   ;;  %vm22_vm1 = vcmask 277640   ;;  %s57_s0 = inlined_call_operand.vmem [shape: f32[2,17,3], index: 0, kind: input, shape index: {}]   ;;  %s58_s1 = inlined_call_operand.vmem [shape: f32[34,3], index: 1, kind: output, shape index: {}]  }
   0x1   :  { %v31_v0 = vld [vmem:[%s57_s0 + $0x4] sm:$0x3]  ;;  %v32_v1 = vld [vmem:[%s57_s0 + $0x2] sm:$0x3]  ;;  %v13_v2 = vld [vmem:[%s57_s0] sm:$0x3] }
   0x2   :  { %8 = vst [vmem:[#allocation1 + $0x10] sm:$0x3] %v31_v0  ;;  %12 = vst [vmem:[#allocation1 + $0x8] sm:$0x3] %v32_v1  ;;  %s34_s0 = smov 17  }
   0x3   :  { %14 = vst [vmem:[#allocation1] sm:$0x3] %v13_v2 }
   0xa   :  { %v19_v3 = vld [vmem:[#allocation1 + $0x1] ss:$8 sm:$0x7]   ;;  %v15_v4 = vld [vmem:[#allocation1] ss:$8 sm:$0x7]  }
   0xb   :  { %20 = vrot.lane.b32.xlu0 %v19_v3, %s34_s0  ;;  %17 = vst.msk [vmem:[#allocation0] sm:$0x7] %vm16_vm0, %v15_v4  }
  0x7d   :  { %v21_v5 = vpop.permute.xlu0 %20  }
  0x7e   :  { %23 = vst.msk [vmem:[#allocation0] sm:$0x7] %vm22_vm1, %v21_v5  }
  0x85   :  { %v27_v6 = vld [vmem:[#allocation0] sm:$0xf] }
  0x86   :  { %29 = vst [vmem:[%s58_s1] sm:$0xf] %v27_v6 }

// kernel: tile.88
= control target key start
LH: loop header
LB: loop body
LE: loop exit
PB: predicated region body
PF: predicated region fallthrough
CT: control target
= control target key end

     0   :  { %s22_s0 = inlined_call_operand.vmem [shape: f32[40], index: 0, kind: input, shape index: {}]   ;;  %s23_s1 = inlined_call_operand.vmem [shape: f32[3,40], index: 1, kind: output, shape index: {}]  }
   0x1   :  { %v4_v0 = vld [vmem:[%s22_s0] ss:$0 sm:$0xff] }
   0x2   :  { %5 = vst [vmem:[%s23_s1] sm:$0xf] %v4_v0 }

// kernel: tile.89
= control target key start
LH: loop header
LB: loop body
LE: loop exit
PB: predicated region body
PF: predicated region fallthrough
CT: control target
= control target key end

     0   :  { %vm7_vm0 = vcmask 326656   ;;  %s30_s8 = smov 40   ;;  %vm13_vm1 = vcmask 982656   ;;  %vm19_vm2 = vcmask 654656   ;;  %s47_s0 = inlined_call_operand.vmem [shape: f32[3,40], index: 0, kind: input, shape index: {}]   ;;  %s48_s1 = inlined_call_operand.vmem [shape: f32[1,120], index: 1, kind: output, shape index: {}]  }
   0x1   :  { %v4_v0 = vld [vmem:[%s47_s0] sm:$0xf]  ;;  %s29_s0 = smov 80  }
   0x2   :  { %5 = vst [vmem:[#allocation1] sm:$0xf] %v4_v0 }
   0x9   :  { %v10_v1 = vld [vmem:[#allocation1 + $0x2] sm:$0x1]   ;;  %v6_v2 = vld [vmem:[#allocation1] sm:$0x1]   ;;  %v16_v3 = vld [vmem:[#allocation1 + $0x1] sm:$0x1]  }
   0xa   :  { %11 = vrot.lane.b32.xlu0 %v10_v1, %s29_s0  ;;  %8 = vst.msk [vmem:[#allocation0] sm:$0x1] %vm7_vm0, %v6_v2  }
   0xe   :  { %17 = vrot.lane.b32.xlu0 %v16_v3, %s30_s8 }
  0x7c   :  { %v12_v4 = vpop.permute.xlu0 %11  }
  0x7d   :  { %14 = vst.msk [vmem:[#allocation0] sm:$0x1] %vm13_vm1, %v12_v4  }
  0x80   :  { %v18_v5 = vpop.permute.xlu0 %17  }
  0x81   :  { %20 = vst.msk [vmem:[#allocation0] sm:$0x1] %vm19_vm2, %v18_v5  }
  0x88   :  { %v24_v6 = vld [vmem:[#allocation0] sm:$0x1] }
  0x89   :  { %26 = vst [vmem:[%s48_s1] sm:$0x1] %v24_v6 }

// kernel: _lambda_.1
= control target key start
LH: loop header
LB: loop body
LE: loop exit
PB: predicated region body
PF: predicated region fallthrough
CT: control target
= control target key end

     0   :  { %vm51_vm0 = vcmask 1040384   ;;  %v2508_v0 = vmov 0.0|0.0   ;;  %vm2509_vm1 = vmmov 1   ;;  %vm2510_vm3 = vmmov 0   ;;  %s2512_s23 = smov 96   ;;  %s2513_s28 = smov 64   ;;  %s3218_s1 = inlined_call_operand.vmem [shape: f32[9,120], index: 1, kind: input, shape index: {}]   ;;  %s3219_s0 = inlined_call_operand.vmem [shape: f32[34,9], index: 0, kind: input, shape index: {}]   ;;  %s3220_s5 = inlined_call_operand.vmem [shape: f32[14,128], index: 5, kind: input, shape index: {}]   ;;  %s3221_s3 = inlined_call_operand.vmem [shape: f32[312,64], index: 3, kind: input, shape index: {}]   ;;  %s3222_s4 = inlined_call_operand.vmem [shape: f32[34,198], index: 4, kind: input, shape index: {}]   ;;  %s3223_s2 = inlined_call_operand.vmem [shape: f32[34,34], index: 2, kind: input, shape index: {}]   ;;  %s3224_s6 = inlined_call_operand.vmem [shape: f32[34,128], index: 6, kind: output, shape index: {}]  }
   0x1   :  { %2315 = vmatprep.subr.bf16.mxu1 %v2508_v0  ;;  %v28_v1 = vld [vmem:[%s3218_s1] sm:$0xff]  ;;  %v29_v2 = vld [vmem:[%s3218_s1 + $0x8] sm:$0x1]  ;;  %vm2317_vm2 = vmpackc.low %vm51_vm0, %vm2509_vm1  ;;  %2340 = vmatprep.subr.bf16.mxu0 %v2508_v0  ;;  %v2511_v4 = vmov 0.0   ;;  %vm35_vm4 = vcmask 72704   ;;  %vm147_vm5 = vcmask 982016  }
   0x2   :  { %v2316_v3 = vpack.c.bf16 %v29_v2, %v28_v1  ;;  %2045 = vmatprep.mubr.msk.f32.mxu1 %vm2510_vm3, %v2511_v4  ;;  %2115 = vmatprep.mubr.msk.f32.mxu0 %vm2510_vm3, %v2511_v4  ;;  %v23_v5 = vld [vmem:[%s3219_s0] sm:$0xff]  ;;  %v24_v6 = vld [vmem:[%s3219_s0 + $0x8] sm:$0xff]  ;;  %v25_v7 = vld [vmem:[%s3219_s0 + $0x10] sm:$0xff]  ;;  %vm160_vm6 = vcmask 975872   ;;  %vm404_vm7 = vcmask 1041408   ;;  %vm388_vm8 = vcmask 277504  }
   0x3   :  { %v26_v8 = vld [vmem:[%s3219_s0 + $0x18] sm:$0xff]  ;;  %v27_v9 = vld [vmem:[%s3219_s0 + $0x20] sm:$0x3]  ;;  %v1862_v10 = vld [vmem:[%s3220_s5 + $0x2] ss:$0 sm:$0xff]  ;;  %vm536_vm9 = vcmask 261120  }
   0x4   :  { %2318 = vmatpush3.bf16.msk.msra.mxu1 %vm2317_vm2, %v2316_v3  ;;  %v233_v31 = vld [vmem:[%s3221_s3] sm:$0xff]  ;;  %v234_v32 = vld [vmem:[%s3221_s3 + $0x8] sm:$0xff]  ;;  %v235_v33 = vld [vmem:[%s3221_s3 + $0x10] sm:$0xff]  ;;  %vm541_vm10 = vcmask 254976   ;;  %s2514_s29 = smov 32   ;;  %vm988_vm11 = vcmask 523520  }
   0x5   :  { %2319 = vmatprep.subr.bf16.mxu1 %v2508_v0  ;;  %v2320_v34 = vpack.c.bf16 %v234_v32, %v233_v31  ;;  %v236_v35 = vld [vmem:[%s3221_s3 + $0x18] sm:$0xff]  ;;  %v237_v60 = vld [vmem:[%s3221_s3 + $0x20] sm:$0xff]  ;;  %v238_v61 = vld [vmem:[%s3221_s3 + $0x28] sm:$0xff]  ;;  %vm1002_vm12 = vcmask 523264   ;;  %vm993_vm13 = vcmask 517376   ;;  %vm1015_vm14 = vcmask 517120  }
   0x6   :  { %v2323_v36 = vpack.c.bf16 %v236_v35, %v235_v33  ;;  %v2326_v62 = vpack.c.bf16 %v238_v61, %v237_v60  ;;  %v239_v2 = vld [vmem:[%s3221_s3 + $0x30] sm:$0xff]  ;;  %v240_v3 = vld [vmem:[%s3221_s3 + $0x38] sm:$0xff]  ;;  %v1870_v32 = vld [vmem:[%s3220_s5 + $0x1] ss:$0 sm:$0xff]  ;;  %vm1402_vm15 = vcmask 785920   ;;  %vm1432_vm0 = vcmask 785408  }
   0x7   :  { %2046 = vmatmul.mubr.msk.f32.vlgmr.msra.gmra.mrb[0].mxu1 %vm35_vm4, %v23_v5  ;;  %v2329_v5 = vpack.c.bf16 %v240_v3, %v239_v2  ;;  %v2722_v2 = vld [vmem:[%s3222_s4 + $0x30] sm:$0xff]  ;;  %vm1407_vm1 = vcmask 779776   ;;  %vm1759_vm2 = vcmask 1042432  }
   0x8   :  { %2048 = vmatprep.mubr.msk.f32.mxu1 %vm2510_vm3, %v2511_v4  ;;  %2321 = vmatpush3.bf16.msra.mxu1 %v2320_v34 }
   0x9   :  { %2322 = vmatprep.subr.bf16.mxu1 %v2508_v0 }
   0xb   :  { %2049 = vmatmul.mubr.msk.f32.gmra.mrb[2].mxu1 %vm35_vm4, %v24_v6  ;;  %v241_v6 = vld [vmem:[%s3221_s3 + $0x40] sm:$0xff] }
   0xc   :  { %2051 = vmatprep.mubr.msk.f32.mxu1 %vm2510_vm3, %v2511_v4  ;;  %2324 = vmatpush3.bf16.msra.mxu1 %v2323_v36 }
   0xd   :  { %2325 = vmatprep.subr.bf16.mxu1 %v2508_v0 }
   0xf   :  { %2052 = vmatmul.mubr.msk.f32.gmra.mrb[4].mxu1 %vm35_vm4, %v25_v7  ;;  %v242_v7 = vld [vmem:[%s3221_s3 + $0x48] sm:$0xff] }
  0x10   :  { %2054 = vmatprep.mubr.msk.f32.mxu1 %vm2510_vm3, %v2511_v4  ;;  %2327 = vmatpush3.bf16.msra.mxu1 %v2326_v62 }
  0x11   :  { %2328 = vmatprep.subr.bf16.mxu1 %v2508_v0 }
  0x13   :  { %2055 = vmatmul.mubr.msk.f32.gmra.mrb[6].mxu1 %vm35_vm4, %v26_v8  ;;  %v2332_v8 = vpack.c.bf16 %v242_v7, %v241_v6 }
  0x14   :  { %2057 = vmatprep.mubr.msk.f32.mxu1 %vm2510_vm3, %v2511_v4  ;;  %2330 = vmatpush3.bf16.msra.mxu1 %v2329_v5 }
  0x15   :  { %2331 = vmatprep.subr.bf16.mxu1 %v2508_v0 }
  0x17   :  { %2058 = vmatmul.mubr.msk.f32.gmra.mrb[8].mxu1 %vm35_vm4, %v27_v9  ;;  %v243_v9 = vld [vmem:[%s3221_s3 + $0x50] sm:$0xff]  ;;  %vm1748_vm4 = vcmask 23552  }
  0x18   :  { %2090 = vmatprep.mubr.msk.f32.mxu1 %vm2510_vm3, %v2511_v4  ;;  %2333 = vmatpush3.bf16.msra.mxu1 %v2332_v8 }
  0x19   :  { %2334 = vmatprep.subr.bf16.mxu1 %v2508_v0 }
  0xda   :  { %v121_v11 = vpop.f32.mrb[0].mxu1 }
  0xdb   :  { %v122_v12 = vadd.f32 %v1862_v10, %v121_v11  ;;  %v2047_v13 = vpop.f32.mrb[1].mxu1 }
  0xdc   :  { %v246_v13 = vld [vmem:[%s3221_s3 + $0x68] sm:$0xff] }
  0xdd   :  { %v148_v14 = vsel %vm147_vm5, %v122_v12, 0.0 }
  0xde   :  { %149 = vadd.xlane.f32.xlu0 %v148_v14  ;;  %v126_v15 = vpop.f32.mrb[2].mxu1 }
  0xdf   :  { %v127_v16 = vadd.f32 %v1862_v10, %v126_v15  ;;  %v2050_v17 = vpop.f32.mrb[3].mxu1  ;;  %v247_v15 = vld [vmem:[%s3221_s3 + $0x70] sm:$0xff] }
  0xe1   :  { %v151_v18 = vsel %vm147_vm5, %v127_v16, 0.0 }
  0xe2   :  { %152 = vadd.xlane.f32.xlu0 %v151_v18  ;;  %v131_v19 = vpop.f32.mrb[4].mxu1 }
  0xe3   :  { %v132_v20 = vadd.f32 %v1862_v10, %v131_v19  ;;  %v2053_v21 = vpop.f32.mrb[5].mxu1 }
  0xe5   :  { %v154_v22 = vsel %vm147_vm5, %v132_v20, 0.0 }
  0xe6   :  { %155 = vadd.xlane.f32.xlu1 %v154_v22  ;;  %v136_v23 = vpop.f32.mrb[6].mxu1 }
  0xe7   :  { %v137_v24 = vadd.f32 %v1862_v10, %v136_v23  ;;  %v2056_v25 = vpop.f32.mrb[7].mxu1 }
  0xe9   :  { %v157_v26 = vsel %vm147_vm5, %v137_v24, 0.0 }
  0xea   :  { %158 = vadd.xlane.f32.xlu1 %v157_v26  ;;  %v141_v27 = vpop.f32.mrb[8].mxu1 }
  0xeb   :  { %v142_v28 = vadd.f32 %v1862_v10, %v141_v27  ;;  %v2059_v29 = vpop.f32.mrb[9].mxu1  ;;  %v244_v10 = vld [vmem:[%s3221_s3 + $0x58] sm:$0xff] }
  0xec   :  { %v2335_v11 = vpack.c.bf16 %v244_v10, %v243_v9  ;;  %v252_v9 = vld [vmem:[%s3222_s4 + $0x40] sm:$0x3] }
  0xed   :  { %v161_v30 = vsel %vm160_vm6, %v142_v28, 0.0 }
  0xee   :  { %162 = vadd.xlane.f32.xlu0 %v161_v30  ;;  %2336 = vmatpush3.bf16.msra.mxu1 %v2335_v11 }
  0xef   :  { %2337 = vmatprep.subr.bf16.mxu1 %v2508_v0 }
 0x16b   :  { %v150_v37 = vpop.xlane.xlu0 %149 }
 0x16c   :  { %v165_v38 = vmul.f32 0.008333334, %v150_v37 }
 0x16e   :  { %v2611_v39 = vsub.f32 %v122_v12, %v165_v38  ;;  %v245_v12 = vld [vmem:[%s3221_s3 + $0x60] sm:$0xff] }
 0x16f   :  { %v153_v40 = vpop.xlane.xlu0 %152  ;;  %v2338_v14 = vpack.c.bf16 %v246_v13, %v245_v12 }
 0x170   :  { %v166_v41 = vmul.f32 0.008333334, %v153_v40  ;;  %v175_v42 = vmul.f32 %v2611_v39, %v2611_v39 }
 0x171   :  { %2339 = vmatpush3.bf16.msra.mxu1 %v2338_v14 }
 0x172   :  { %v2615_v43 = vsub.f32 %v127_v16, %v166_v41  ;;  %v180_v44 = vsel %vm147_vm5, %v175_v42, 0.0  ;;  %2088 = vmatprep.subr.mxu1 %v2511_v4 }
 0x173   :  { %v156_v45 = vpop.xlane.xlu1 %155  ;;  %181 = vadd.xlane.f32.xlu1 %v180_v44 }
 0x174   :  { %v167_v46 = vmul.f32 0.008333334, %v156_v45  ;;  %v176_v47 = vmul.f32 %v2615_v43, %v2615_v43 }
 0x175   :  { %2089 = vmatpush3.msra.mxu1 %v247_v15 }
 0x176   :  { %v2620_v48 = vsub.f32 %v132_v20, %v167_v46  ;;  %v183_v49 = vsel %vm147_vm5, %v176_v47, 0.0  ;;  %2352 = vmatprep.subr.bf16.mxu1 %v2508_v0 }
 0x177   :  { %v159_v50 = vpop.xlane.xlu1 %158  ;;  %184 = vadd.xlane.f32.xlu0 %v183_v49 }
 0x178   :  { %v168_v51 = vmul.f32 0.008333334, %v159_v50  ;;  %v177_v52 = vmul.f32 %v2620_v48, %v2620_v48 }
 0x17a   :  { %v2625_v53 = vsub.f32 %v137_v24, %v168_v51  ;;  %v186_v54 = vsel %vm147_vm5, %v177_v52, 0.0 }
 0x17b   :  { %187 = vadd.xlane.f32.xlu1 %v186_v54  ;;  %v163_v55 = vpop.xlane.xlu0 %162 }
 0x17c   :  { %v169_v56 = vmul.f32 0.008333334, %v163_v55  ;;  %v178_v57 = vmul.f32 %v2625_v53, %v2625_v53  ;;  %v2704_v55 = vld [vmem:[%s3222_s4] sm:$0xff] }
 0x17e   :  { %v2630_v58 = vsub.f32 %v142_v28, %v169_v56  ;;  %v189_v59 = vsel %vm147_vm5, %v178_v57, 0.0  ;;  %v1869_v28 = vld [vmem:[%s3220_s5] ss:$0 sm:$0xff]  ;;  %v2709_v56 = vld [vmem:[%s3222_s4 + $0x10] sm:$0xff] }
 0x17f   :  { %190 = vadd.xlane.f32.xlu0 %v189_v59 }
 0x180   :  { %v179_v63 = vmul.f32 %v2630_v58, %v2630_v58 }
 0x182   :  { %v192_v1 = vsel %vm160_vm6, %v179_v63, 0.0 }
 0x183   :  { %193 = vadd.xlane.f32.xlu1 %v192_v1  ;;  %v2717_v1 = vld [vmem:[%s3222_s4 + $0x20] sm:$0xff] }
 0x200   :  { %v182_v16 = vpop.xlane.xlu1 %181 }
 0x201   :  { %v195_v17 = vmul.f32 0.008333334, %v182_v16 }
 0x203   :  { %v200_v18 = vadd.f32 1e-05, %v195_v17 }
 0x204   :  { %v185_v19 = vpop.xlane.xlu0 %184 }
 0x205   :  { %2448 = vrsqrt.f32 %v200_v18  ;;  %v196_v20 = vmul.f32 0.008333334, %v185_v19 }
 0x207   :  { %v201_v21 = vadd.f32 1e-05, %v196_v20 }
 0x208   :  { %v188_v22 = vpop.xlane.xlu1 %187 }
 0x209   :  { %2450 = vrsqrt.f32 %v201_v21  ;;  %v197_v23 = vmul.f32 0.008333334, %v188_v22  ;;  %v2736_v21 = vld [vmem:[%s3223_s2] sm:$0xff] }
 0x20b   :  { %v202_v24 = vadd.f32 1e-05, %v197_v23  ;;  %v2747_v23 = vld [vmem:[%s3223_s2 + $0x8] sm:$0xff] }
 0x20c   :  { %v191_v25 = vpop.xlane.xlu0 %190 }
 0x20d   :  { %2452 = vrsqrt.f32 %v202_v24  ;;  %v198_v26 = vmul.f32 0.008333334, %v191_v25  ;;  %v2756_v24 = vld [vmem:[%s3223_s2 + $0x10] sm:$0xff]  ;;  %v2765_v25 = vld [vmem:[%s3223_s2 + $0x18] sm:$0xff] }
 0x20f   :  { %v2449_v27 = vpop.eup %2448  ;;  %v203_v29 = vadd.f32 1e-05, %v198_v26  ;;  %v368_v26 = vld [vmem:[%s3223_s2 + $0x20] sm:$0x3] }
 0x210   :  { %v210_v30 = vmul.f32 %v2449_v27, %v2611_v39  ;;  %v194_v31 = vpop.xlane.xlu1 %193  ;;  %v1882_v27 = vld [vmem:[%s3220_s5 + $0x3] ss:$0 sm:$0xff] }
 0x211   :  { %2454 = vrsqrt.f32 %v203_v29  ;;  %v199_v33 = vmul.f32 0.008333334, %v194_v31 }
 0x212   :  { %v219_v34 = vmul.f32 %v1869_v28, %v210_v30 }
 0x213   :  { %v2451_v35 = vpop.eup %2450  ;;  %v204_v36 = vadd.f32 1e-05, %v199_v33 }
 0x214   :  { %v228_v37 = vadd.f32 %v1870_v32, %v219_v34  ;;  %v211_v38 = vmul.f32 %v2451_v35, %v2615_v43 }
 0x215   :  { %2456 = vrsqrt.f32 %v204_v36 }
 0x216   :  { %2091 = vmatmul.mubr.msk.f32.vlgmr.msra.gmra.mrb[10].mxu1 %vm147_vm5, %v228_v37  ;;  %v220_v40 = vmul.f32 %v1869_v28, %v211_v38 }
 0x217   :  { %v2453_v41 = vpop.eup %2452  ;;  %2093 = vmatprep.mubr.msk.f32.mxu1 %vm2510_vm3, %v2511_v4 }
 0x218   :  { %v229_v39 = vadd.f32 %v1870_v32, %v220_v40  ;;  %v212_v42 = vmul.f32 %v2453_v41, %v2620_v48 }
 0x21a   :  { %2094 = vmatmul.mubr.msk.f32.gmra.mrb[12].mxu1 %vm147_vm5, %v229_v39  ;;  %v221_v44 = vmul.f32 %v1869_v28, %v212_v42 }
 0x21b   :  { %v2455_v45 = vpop.eup %2454  ;;  %2096 = vmatprep.mubr.msk.f32.mxu1 %vm2510_vm3, %v2511_v4 }
 0x21c   :  { %v230_v46 = vadd.f32 %v1870_v32, %v221_v44  ;;  %v213_v43 = vmul.f32 %v2455_v45, %v2625_v53 }
 0x21e   :  { %2097 = vmatmul.mubr.msk.f32.gmra.mrb[14].mxu1 %vm147_vm5, %v230_v46  ;;  %v222_v47 = vmul.f32 %v1869_v28, %v213_v43 }
 0x21f   :  { %v2457_v49 = vpop.eup %2456  ;;  %2099 = vmatprep.mubr.msk.f32.mxu1 %vm2510_vm3, %v2511_v4 }
 0x220   :  { %v231_v50 = vadd.f32 %v1870_v32, %v222_v47  ;;  %v214_v48 = vmul.f32 %v2457_v49, %v2630_v58 }
 0x222   :  { %2100 = vmatmul.mubr.msk.f32.gmra.mrb[16].mxu1 %vm147_vm5, %v231_v50  ;;  %v223_v51 = vmul.f32 %v1869_v28, %v214_v48 }
 0x223   :  { %2102 = vmatprep.mubr.msk.f32.mxu1 %vm2510_vm3, %v2511_v4 }
 0x224   :  { %v232_v52 = vadd.f32 %v1870_v32, %v223_v51 }
 0x226   :  { %2103 = vmatmul.mubr.msk.f32.gmra.mrb[18].mxu1 %vm147_vm5, %v232_v52 }
 0x227   :  { %2163 = vmatprep.mubr.msk.f32.mxu1 %vm2510_vm3, %v2511_v4 }
 0x2e9   :  { %v335_v53 = vpop.f32.mrb[10].mxu1 }
 0x2ea   :  { %v2092_v54 = vpop.f32.mrb[11].mxu1  ;;  %v359_v58 = vmul.f32 %v335_v53, %v2704_v55 }
 0x2ed   :  { %v340_v57 = vpop.f32.mrb[12].mxu1 }
 0x2ee   :  { %v360_v59 = vmul.f32 %v340_v57, %v2709_v56  ;;  %v2095_v60 = vpop.f32.mrb[13].mxu1 }
 0x2f0   :  { %v2408_v61 = vpack.i.bf16 %v360_v59, %v359_v58 }
 0x2f1   :  { %v345_v62 = vpop.f32.mrb[14].mxu1 }
 0x2f2   :  { %2409 = vrot.lane.b32.xlu0 %v2408_v61, %s2512_s23  ;;  %v2098_v63 = vpop.f32.mrb[15].mxu1  ;;  %v361_v5 = vmul.f32 %v345_v62, %v2717_v1 }
 0x2f5   :  { %v350_v3 = vpop.f32.mrb[16].mxu1 }
 0x2f6   :  { %v362_v6 = vmul.f32 %v350_v3, %v2722_v2  ;;  %v2101_v7 = vpop.f32.mrb[17].mxu1 }
 0x2f8   :  { %v2413_v8 = vpack.i.bf16 %v362_v6, %v361_v5 }
 0x2f9   :  { %v355_v10 = vpop.f32.mrb[18].mxu1 }
 0x2fa   :  { %2414 = vrot.lane.b32.xlu1 %v2413_v8, %s2512_s23  ;;  %v2104_v11 = vpop.f32.mrb[19].mxu1  ;;  %v363_v12 = vmul.f32 %v355_v10, %v252_v9 }
 0x2fe   :  { %382 = vrot.lane.b32.xlu1 %v363_v12, %s2512_s23 }
 0x364   :  { %v2410_v13 = vpop.permute.xlu0 %2409 }
 0x365   :  { %v2412_v14 = vunpack.i.h.bf16 %v2410_v13  ;;  %v2411_v15 = vunpack.i.l.bf16 %v2410_v13 }
 0x367   :  { %v2341_v16 = vpack.c.bf16 %v2412_v14, %v2411_v15 }
 0x369   :  { %2342 = vmatpush3.bf16.msra.mxu0 %v2341_v16 }
 0x36a   :  { %2343 = vmatprep.subr.bf16.mxu0 %v2508_v0 }
 0x36c   :  { %v2415_v17 = vpop.permute.xlu1 %2414 }
 0x36d   :  { %v2417_v18 = vunpack.i.h.bf16 %v2415_v17  ;;  %v2416_v19 = vunpack.i.l.bf16 %v2415_v17 }
 0x36f   :  { %v2344_v20 = vpack.c.bf16 %v2417_v18, %v2416_v19 }
 0x370   :  { %v383_v22 = vpop.permute.xlu1 %382 }
 0x371   :  { %2345 = vmatpush3.bf16.msra.mxu0 %v2344_v20 }
 0x372   :  { %2113 = vmatprep.subr.mxu0 %v2511_v4 }
 0x375   :  { %2114 = vmatpush3.msk.msra.mxu0 %vm404_vm7, %v383_v22 }
 0x376   :  { %2116 = vmatmul.mubr.msk.f32.vlgmr.msra.gmra.mrb[0].mxu0 %vm388_vm8, %v2736_v21  ;;  %2346 = vmatprep.subr.bf16.mxu0 %v2508_v0 }
 0x377   :  { %2118 = vmatprep.mubr.msk.f32.mxu0 %vm2510_vm3, %v2511_v4 }
 0x37a   :  { %2119 = vmatmul.mubr.msk.f32.gmra.mrb[2].mxu0 %vm388_vm8, %v2747_v23 }
 0x37b   :  { %2121 = vmatprep.mubr.msk.f32.mxu0 %vm2510_vm3, %v2511_v4 }
 0x37e   :  { %2122 = vmatmul.mubr.msk.f32.gmra.mrb[4].mxu0 %vm388_vm8, %v2756_v24 }
 0x37f   :  { %2124 = vmatprep.mubr.msk.f32.mxu0 %vm2510_vm3, %v2511_v4 }
 0x382   :  { %2125 = vmatmul.mubr.msk.f32.gmra.mrb[6].mxu0 %vm388_vm8, %v2765_v25 }
 0x383   :  { %2127 = vmatprep.mubr.msk.f32.mxu0 %vm2510_vm3, %v2511_v4 }
 0x386   :  { %2128 = vmatmul.mubr.msk.f32.gmra.mrb[8].mxu0 %vm388_vm8, %v368_v26 }
 0x387   :  { %2138 = vmatprep.mubr.msk.f32.mxu0 %vm2510_vm3, %v2511_v4 }
 0x449   :  { %v473_v28 = vpop.f32.mrb[0].mxu0 }
 0x44a   :  { %v497_v29 = vadd.f32 %v473_v28, %v359_v58  ;;  %v2117_v30 = vpop.f32.mrb[1].mxu0 }
 0x44c   :  { %v506_v31 = vadd.f32 %v1882_v27, %v497_v29 }
 0x44d   :  { %v478_v32 = vpop.f32.mrb[2].mxu0 }
 0x44e   :  { %v516_v33 = vmul.f32 0.70710677, %v506_v31  ;;  %v498_v34 = vadd.f32 %v478_v32, %v360_v59  ;;  %v2120_v35 = vpop.f32.mrb[3].mxu0  ;;  %v511_v52 = vmul.f32 0.5, %v506_v31 }
 0x450   :  { %2458 = verf.f32 %v516_v33  ;;  %v507_v36 = vadd.f32 %v1882_v27, %v498_v34 }
 0x451   :  { %v483_v37 = vpop.f32.mrb[4].mxu0 }
 0x452   :  { %v517_v38 = vmul.f32 0.70710677, %v507_v36  ;;  %v499_v40 = vadd.f32 %v483_v37, %v361_v5  ;;  %v2123_v41 = vpop.f32.mrb[5].mxu0  ;;  %v512_v60 = vmul.f32 0.5, %v507_v36 }
 0x454   :  { %2460 = verf.f32 %v517_v38  ;;  %v508_v39 = vadd.f32 %v1882_v27, %v499_v40 }
 0x455   :  { %v488_v42 = vpop.f32.mrb[6].mxu0 }
 0x456   :  { %v518_v44 = vmul.f32 0.70710677, %v508_v39  ;;  %v500_v45 = vadd.f32 %v488_v42, %v362_v6  ;;  %v2126_v46 = vpop.f32.mrb[7].mxu0  ;;  %v513_v3 = vmul.f32 0.5, %v508_v39 }
 0x458   :  { %2462 = verf.f32 %v518_v44  ;;  %v509_v43 = vadd.f32 %v1882_v27, %v500_v45 }
 0x459   :  { %v493_v47 = vpop.f32.mrb[8].mxu0 }
 0x45a   :  { %v2459_v49 = vpop.eup %2458  ;;  %v519_v50 = vmul.f32 0.70710677, %v509_v43  ;;  %v501_v48 = vadd.f32 %v493_v47, %v363_v12  ;;  %v2129_v51 = vpop.f32.mrb[9].mxu0  ;;  %v514_v9 = vmul.f32 0.5, %v509_v43 }
 0x45b   :  { %v526_v53 = vadd.f32 1.0, %v2459_v49 }
 0x45c   :  { %2464 = verf.f32 %v519_v50  ;;  %v510_v54 = vadd.f32 %v1882_v27, %v501_v48 }
 0x45d   :  { %v531_v57 = vmul.f32 %v526_v53, %v511_v52 }
 0x45e   :  { %v2461_v58 = vpop.eup %2460  ;;  %v520_v59 = vmul.f32 0.70710677, %v510_v54  ;;  %v515_v15 = vmul.f32 0.5, %v510_v54  ;;  %v634_v54 = vld [vmem:[%s3221_s3 + $0x78] sm:$0xff] }
 0x45f   :  { %537 = vst.msk [vmem:[#allocation2] sm:$0xff] %vm536_vm9, %v531_v57  ;;  %v527_v61 = vadd.f32 1.0, %v2461_v58  ;;  %v635_v57 = vld [vmem:[%s3221_s3 + $0x80] sm:$0xff] }
 0x460   :  { %2466 = verf.f32 %v520_v59  ;;  %v2347_v58 = vpack.c.bf16 %v635_v57, %v634_v54  ;;  %v636_v59 = vld [vmem:[%s3221_s3 + $0x88] sm:$0xff] }
 0x461   :  { %v532_v62 = vmul.f32 %v527_v61, %v512_v60  ;;  %v637_v60 = vld [vmem:[%s3221_s3 + $0x90] sm:$0xff] }
 0x462   :  { %v2463_v63 = vpop.eup %2462  ;;  %2348 = vmatpush3.bf16.msra.mxu0 %v2347_v58  ;;  %v2350_v61 = vpack.c.bf16 %v637_v60, %v636_v59 }
 0x463   :  { %538 = vst.msk [vmem:[#allocation2 + $0x8] sm:$0xff] %vm536_vm9, %v532_v62  ;;  %v528_v5 = vadd.f32 1.0, %v2463_v63  ;;  %2349 = vmatprep.subr.bf16.mxu0 %v2508_v0 }
 0x465   :  { %v533_v6 = vmul.f32 %v528_v5, %v513_v3 }
 0x466   :  { %v2465_v7 = vpop.eup %2464  ;;  %v543_v8 = vld [vmem:[#allocation2] sm:$0xff]  ;;  %2351 = vmatpush3.bf16.msra.mxu0 %v2350_v61 }
 0x467   :  { %539 = vst.msk [vmem:[#allocation2 + $0x10] sm:$0xff] %vm536_vm9, %v533_v6  ;;  %v529_v10 = vadd.f32 1.0, %v2465_v7  ;;  %v550_v11 = vsel %vm536_vm9, %v543_v8, 0.0  ;;  %2358 = vmatprep.subr.bf16.mxu0 %v2508_v0 }
 0x468   :  { %551 = vadd.xlane.f32.xlu1 %v550_v11 }
 0x469   :  { %v534_v12 = vmul.f32 %v529_v10, %v514_v9 }
 0x46a   :  { %v2467_v13 = vpop.eup %2466  ;;  %v544_v14 = vld [vmem:[#allocation2 + $0x8] sm:$0xff] }
 0x46b   :  { %540 = vst.msk [vmem:[#allocation2 + $0x18] sm:$0xff] %vm536_vm9, %v534_v12  ;;  %v530_v16 = vadd.f32 1.0, %v2467_v13  ;;  %v553_v17 = vsel %vm536_vm9, %v544_v14, 0.0 }
 0x46c   :  { %554 = vadd.xlane.f32.xlu0 %v553_v17 }
 0x46d   :  { %v535_v18 = vmul.f32 %v530_v16, %v515_v15 }
 0x46e   :  { %v545_v19 = vld [vmem:[#allocation2 + $0x10] sm:$0xff] }
 0x46f   :  { %v556_v20 = vsel %vm536_vm9, %v545_v19, 0.0  ;;  %542 = vst.msk [vmem:[#allocation2 + $0x20] sm:$0x3] %vm541_vm10, %v535_v18  ;;  %v1884_v18 = vld [vmem:[%s3220_s5 + $0x5] ss:$0 sm:$0xff] }
 0x470   :  { %557 = vadd.xlane.f32.xlu0 %v556_v20 }
 0x472   :  { %v546_v22 = vld [vmem:[#allocation2 + $0x18] sm:$0xff] }
 0x473   :  { %v559_v26 = vsel %vm536_vm9, %v546_v22, 0.0 }
 0x474   :  { %560 = vadd.xlane.f32.xlu0 %v559_v26 }
 0x476   :  { %v547_v27 = vld [vmem:[#allocation2 + $0x20] sm:$0x3] }
 0x477   :  { %v562_v28 = vsel %vm541_vm10, %v547_v27, 0.0 }
 0x478   :  { %563 = vadd.xlane.f32.xlu1 %v562_v28 }
 0x4f5   :  { %v552_v29 = vpop.xlane.xlu1 %551 }
 0x4f6   :  { %v566_v30 = vmul.f32 0.03125, %v552_v29 }
 0x4f8   :  { %v571_v31 = vsub.f32 %v543_v8, %v566_v30 }
 0x4f9   :  { %v555_v32 = vpop.xlane.xlu0 %554 }
 0x4fa   :  { %v567_v33 = vmul.f32 0.03125, %v555_v32  ;;  %v576_v34 = vmul.f32 %v571_v31, %v571_v31 }
 0x4fc   :  { %v572_v35 = vsub.f32 %v544_v14, %v567_v33  ;;  %v581_v36 = vsel %vm536_vm9, %v576_v34, 0.0  ;;  %v1883_v14 = vld [vmem:[%s3220_s5 + $0x4] ss:$0 sm:$0xff] }
 0x4fd   :  { %v558_v37 = vpop.xlane.xlu0 %557  ;;  %582 = vadd.xlane.f32.xlu0 %v581_v36 }
 0x4fe   :  { %v568_v38 = vmul.f32 0.03125, %v558_v37  ;;  %v577_v40 = vmul.f32 %v572_v35, %v572_v35 }
 0x500   :  { %v573_v41 = vsub.f32 %v545_v19, %v568_v38  ;;  %v584_v39 = vsel %vm536_vm9, %v577_v40, 0.0 }
 0x501   :  { %v561_v42 = vpop.xlane.xlu0 %560  ;;  %585 = vadd.xlane.f32.xlu1 %v584_v39 }
 0x502   :  { %v569_v44 = vmul.f32 0.03125, %v561_v42  ;;  %v578_v45 = vmul.f32 %v573_v41, %v573_v41 }
 0x504   :  { %v574_v46 = vsub.f32 %v546_v22, %v569_v44  ;;  %v587_v43 = vsel %vm536_vm9, %v578_v45, 0.0 }
 0x505   :  { %588 = vadd.xlane.f32.xlu0 %v587_v43  ;;  %v564_v47 = vpop.xlane.xlu1 %563 }
 0x506   :  { %v570_v49 = vmul.f32 0.03125, %v564_v47  ;;  %v579_v50 = vmul.f32 %v574_v46, %v574_v46 }
 0x508   :  { %v575_v48 = vsub.f32 %v547_v27, %v570_v49  ;;  %v590_v51 = vsel %vm536_vm9, %v579_v50, 0.0 }
 0x509   :  { %591 = vadd.xlane.f32.xlu1 %v590_v51 }
 0x50a   :  { %v580_v52 = vmul.f32 %v575_v48, %v575_v48 }
 0x50c   :  { %v593_v53 = vsel %vm541_vm10, %v580_v52, 0.0 }
 0x50d   :  { %594 = vadd.xlane.f32.xlu0 %v593_v53 }
 0x58a   :  { %v583_v62 = vpop.xlane.xlu0 %582 }
 0x58b   :  { %v596_v63 = vmul.f32 0.03125, %v583_v62 }
 0x58d   :  { %v601_v3 = vadd.f32 1e-05, %v596_v63 }
 0x58e   :  { %v586_v5 = vpop.xlane.xlu1 %585 }
 0x58f   :  { %2468 = vrsqrt.f32 %v601_v3  ;;  %v597_v6 = vmul.f32 0.03125, %v586_v5  ;;  %v642_v3 = vld [vmem:[%s3222_s4 + $0x40] sm:$0x3] }
 0x591   :  { %v602_v7 = vadd.f32 1e-05, %v597_v6 }
 0x592   :  { %v589_v8 = vpop.xlane.xlu0 %588 }
 0x593   :  { %2470 = vrsqrt.f32 %v602_v7  ;;  %v598_v9 = vmul.f32 0.03125, %v589_v8 }
 0x595   :  { %v603_v10 = vadd.f32 1e-05, %v598_v9 }
 0x596   :  { %v592_v11 = vpop.xlane.xlu1 %591 }
 0x597   :  { %2472 = vrsqrt.f32 %v603_v10  ;;  %v599_v12 = vmul.f32 0.03125, %v592_v11 }
 0x599   :  { %v2469_v13 = vpop.eup %2468  ;;  %v604_v15 = vadd.f32 1e-05, %v599_v12 }
 0x59a   :  { %v611_v16 = vmul.f32 %v2469_v13, %v571_v31  ;;  %v595_v17 = vpop.xlane.xlu0 %594  ;;  %v778_v13 = vld [vmem:[%s3223_s2 + $0x20] sm:$0x3] }
 0x59b   :  { %2474 = vrsqrt.f32 %v604_v15  ;;  %v600_v19 = vmul.f32 0.03125, %v595_v17 }
 0x59c   :  { %v620_v20 = vmul.f32 %v1883_v14, %v611_v16 }
 0x59d   :  { %v2471_v22 = vpop.eup %2470  ;;  %v605_v26 = vadd.f32 1e-05, %v600_v19 }
 0x59e   :  { %v629_v27 = vadd.f32 %v1884_v18, %v620_v20  ;;  %v612_v28 = vmul.f32 %v2471_v22, %v572_v35 }
 0x59f   :  { %2476 = vrsqrt.f32 %v605_v26 }
 0x5a0   :  { %2139 = vmatmul.mubr.msk.f32.vlgmr.msra.gmra.mrb[10].mxu0 %vm536_vm9, %v629_v27  ;;  %v621_v29 = vmul.f32 %v1883_v14, %v612_v28 }
 0x5a1   :  { %v2473_v30 = vpop.eup %2472  ;;  %2141 = vmatprep.mubr.msk.f32.mxu0 %vm2510_vm3, %v2511_v4 }
 0x5a2   :  { %v630_v31 = vadd.f32 %v1884_v18, %v621_v29  ;;  %v613_v32 = vmul.f32 %v2473_v30, %v573_v41 }
 0x5a4   :  { %2142 = vmatmul.mubr.msk.f32.gmra.mrb[12].mxu0 %vm536_vm9, %v630_v31  ;;  %v622_v33 = vmul.f32 %v1883_v14, %v613_v32 }
 0x5a5   :  { %v2475_v34 = vpop.eup %2474  ;;  %2144 = vmatprep.mubr.msk.f32.mxu0 %vm2510_vm3, %v2511_v4 }
 0x5a6   :  { %v631_v36 = vadd.f32 %v1884_v18, %v622_v33  ;;  %v614_v37 = vmul.f32 %v2475_v34, %v574_v46 }
 0x5a8   :  { %2145 = vmatmul.mubr.msk.f32.gmra.mrb[14].mxu0 %vm536_vm9, %v631_v36  ;;  %v623_v35 = vmul.f32 %v1883_v14, %v614_v37 }
 0x5a9   :  { %v2477_v38 = vpop.eup %2476  ;;  %2147 = vmatprep.mubr.msk.f32.mxu0 %vm2510_vm3, %v2511_v4 }
 0x5aa   :  { %v632_v40 = vadd.f32 %v1884_v18, %v623_v35  ;;  %v615_v39 = vmul.f32 %v2477_v38, %v575_v48 }
 0x5ac   :  { %2148 = vmatmul.mubr.msk.f32.gmra.mrb[16].mxu0 %vm536_vm9, %v632_v40  ;;  %v624_v41 = vmul.f32 %v1883_v14, %v615_v39  ;;  %v1896_v14 = vld [vmem:[%s3220_s5 + $0x6] ss:$0 sm:$0xff] }
 0x5ad   :  { %2150 = vmatprep.mubr.msk.f32.mxu0 %vm2510_vm3, %v2511_v4 }
 0x5ae   :  { %v633_v42 = vadd.f32 %v1884_v18, %v624_v41 }
 0x5b0   :  { %2151 = vmatmul.mubr.msk.f32.gmra.mrb[18].mxu0 %vm536_vm9, %v633_v42 }
 0x5b1   :  { %2194 = vmatprep.mubr.msk.f32.mxu0 %vm2510_vm3, %v2511_v4 }
 0x673   :  { %v725_v44 = vpop.f32.mrb[10].mxu0 }
 0x674   :  { %754 = vrot.lane.b32.xlu1 %v725_v44, %s2513_s28  ;;  %v2140_v45 = vpop.f32.mrb[11].mxu0 }
 0x677   :  { %v730_v46 = vpop.f32.mrb[12].mxu0 }
 0x678   :  { %756 = vrot.lane.b32.xlu0 %v730_v46, %s2513_s28  ;;  %v2143_v43 = vpop.f32.mrb[13].mxu0 }
 0x67b   :  { %v735_v47 = vpop.f32.mrb[14].mxu0 }
 0x67c   :  { %758 = vrot.lane.b32.xlu1 %v735_v47, %s2513_s28  ;;  %v2146_v49 = vpop.f32.mrb[15].mxu0 }
 0x67f   :  { %v740_v50 = vpop.f32.mrb[16].mxu0 }
 0x680   :  { %760 = vrot.lane.b32.xlu1 %v740_v50, %s2513_s28  ;;  %v2149_v48 = vpop.f32.mrb[17].mxu0 }
 0x683   :  { %v745_v51 = vpop.f32.mrb[18].mxu0 }
 0x684   :  { %762 = vrot.lane.b32.xlu1 %v745_v51, %s2513_s28  ;;  %v2152_v52 = vpop.f32.mrb[19].mxu0 }
 0x6e6   :  { %v755_v53 = vpop.permute.xlu1 %754 }
 0x6e7   :  { %v769_v57 = vmul.f32 %v755_v53, %v2704_v55 }
 0x6ea   :  { %v757_v54 = vpop.permute.xlu0 %756 }
 0x6eb   :  { %v770_v58 = vmul.f32 %v757_v54, %v2709_v56 }
 0x6ed   :  { %v2418_v59 = vpack.i.bf16 %v770_v58, %v769_v57 }
 0x6ee   :  { %v759_v60 = vpop.permute.xlu1 %758 }
 0x6ef   :  { %2419 = vrot.lane.b32.xlu0 %v2418_v59, %s2514_s29  ;;  %v771_v62 = vmul.f32 %v759_v60, %v2717_v1 }
 0x6f2   :  { %v761_v61 = vpop.permute.xlu1 %760 }
 0x6f3   :  { %v2839_v63 = vmul.f32 %v761_v61, %v2722_v2 }
 0x6f5   :  { %v2423_v5 = vpack.i.bf16 %v2839_v63, %v771_v62 }
 0x6f6   :  { %v763_v6 = vpop.permute.xlu1 %762 }
 0x6f7   :  { %v2845_v55 = vmul.f32 %v763_v6, %v642_v3  ;;  %2424 = vrot.lane.b32.xlu1 %v2423_v5, %s2514_s29 }
 0x6f9   :  { %792 = vrot.lane.b32.xlu0 %v2845_v55, %s2514_s29 }
 0x6fd   :  { %935 = vrot.lane.b32.xlu0 %v1896_v14, %s2513_s28 }
 0x761   :  { %v2420_v56 = vpop.permute.xlu0 %2419 }
 0x762   :  { %v2422_v7 = vunpack.i.h.bf16 %v2420_v56  ;;  %v2421_v8 = vunpack.i.l.bf16 %v2420_v56 }
 0x764   :  { %v2353_v9 = vpack.c.bf16 %v2422_v7, %v2421_v8 }
 0x766   :  { %2354 = vmatpush3.bf16.msra.mxu1 %v2353_v9 }
 0x767   :  { %2355 = vmatprep.subr.bf16.mxu1 %v2508_v0 }
 0x769   :  { %v2425_v1 = vpop.permute.xlu1 %2424 }
 0x76a   :  { %v2427_v2 = vunpack.i.h.bf16 %v2425_v1  ;;  %v2426_v10 = vunpack.i.l.bf16 %v2425_v1 }
 0x76b   :  { %v793_v12 = vpop.permute.xlu0 %792 }
 0x76c   :  { %v2356_v11 = vpack.c.bf16 %v2427_v2, %v2426_v10 }
 0x76e   :  { %2357 = vmatpush3.bf16.msra.mxu1 %v2356_v11 }
 0x76f   :  { %2161 = vmatprep.subr.mxu1 %v2511_v4  ;;  %v936_v30 = vpop.permute.xlu0 %935 }
 0x772   :  { %2162 = vmatpush3.msk.msra.mxu1 %vm404_vm7, %v793_v12 }
 0x773   :  { %2164 = vmatmul.mubr.msk.f32.vlgmr.msra.gmra.mrb[20].mxu1 %vm388_vm8, %v2736_v21  ;;  %2370 = vmatprep.subr.bf16.mxu1 %v2508_v0 }
 0x774   :  { %2166 = vmatprep.mubr.msk.f32.mxu1 %vm2510_vm3, %v2511_v4 }
 0x777   :  { %2167 = vmatmul.mubr.msk.f32.gmra.mrb[22].mxu1 %vm388_vm8, %v2747_v23 }
 0x778   :  { %2169 = vmatprep.mubr.msk.f32.mxu1 %vm2510_vm3, %v2511_v4 }
 0x77b   :  { %2170 = vmatmul.mubr.msk.f32.gmra.mrb[24].mxu1 %vm388_vm8, %v2756_v24 }
 0x77c   :  { %2172 = vmatprep.mubr.msk.f32.mxu1 %vm2510_vm3, %v2511_v4 }
 0x77f   :  { %2173 = vmatmul.mubr.msk.f32.gmra.mrb[26].mxu1 %vm388_vm8, %v2765_v25 }
 0x780   :  { %2175 = vmatprep.mubr.msk.f32.mxu1 %vm2510_vm3, %v2511_v4 }
 0x783   :  { %2176 = vmatmul.mubr.msk.f32.gmra.mrb[28].mxu1 %vm388_vm8, %v778_v13 }
 0x784   :  { %2219 = vmatprep.mubr.msk.f32.mxu1 %vm2510_vm3, %v2511_v4 }
 0x846   :  { %v881_v15 = vpop.f32.mrb[20].mxu1 }
 0x847   :  { %910 = vrot.lane.b32.xlu1 %v881_v15, %s2513_s28  ;;  %v2165_v16 = vpop.f32.mrb[21].mxu1 }
 0x84a   :  { %v886_v17 = vpop.f32.mrb[22].mxu1 }
 0x84b   :  { %912 = vrot.lane.b32.xlu1 %v886_v17, %s2513_s28  ;;  %v2168_v18 = vpop.f32.mrb[23].mxu1 }
 0x84e   :  { %v891_v19 = vpop.f32.mrb[24].mxu1 }
 0x84f   :  { %914 = vrot.lane.b32.xlu0 %v891_v19, %s2513_s28  ;;  %v2171_v20 = vpop.f32.mrb[25].mxu1 }
 0x852   :  { %v896_v22 = vpop.f32.mrb[26].mxu1 }
 0x853   :  { %916 = vrot.lane.b32.xlu1 %v896_v22, %s2513_s28  ;;  %v2174_v26 = vpop.f32.mrb[27].mxu1 }
 0x856   :  { %v901_v27 = vpop.f32.mrb[28].mxu1 }
 0x857   :  { %918 = vrot.lane.b32.xlu0 %v901_v27, %s2513_s28  ;;  %v2177_v28 = vpop.f32.mrb[29].mxu1 }
 0x8b9   :  { %v911_v29 = vpop.permute.xlu1 %910 }
 0x8ba   :  { %v925_v31 = vadd.f32 %v911_v29, %v769_v57 }
 0x8bc   :  { %v938_v32 = vadd.f32 %v936_v30, %v925_v31 }
 0x8bd   :  { %v913_v33 = vpop.permute.xlu1 %912 }
 0x8be   :  { %v926_v34 = vadd.f32 %v913_v33, %v770_v58  ;;  %v948_v36 = vmul.f32 0.70710677, %v938_v32  ;;  %v943_v50 = vmul.f32 0.5, %v938_v32 }
 0x8c0   :  { %v939_v37 = vadd.f32 %v936_v30, %v926_v34  ;;  %2478 = verf.f32 %v948_v36 }
 0x8c1   :  { %v915_v35 = vpop.permute.xlu0 %914 }
 0x8c2   :  { %v949_v38 = vmul.f32 0.70710677, %v939_v37  ;;  %v927_v40 = vadd.f32 %v915_v35, %v771_v62  ;;  %v944_v57 = vmul.f32 0.5, %v939_v37 }
 0x8c4   :  { %2480 = verf.f32 %v949_v38  ;;  %v940_v39 = vadd.f32 %v936_v30, %v927_v40 }
 0x8c5   :  { %v917_v41 = vpop.permute.xlu1 %916 }
 0x8c6   :  { %v950_v42 = vmul.f32 0.70710677, %v940_v39  ;;  %v928_v44 = vadd.f32 %v917_v41, %v2839_v63  ;;  %v945_v61 = vmul.f32 0.5, %v940_v39 }
 0x8c8   :  { %2482 = verf.f32 %v950_v42  ;;  %v941_v45 = vadd.f32 %v936_v30, %v928_v44 }
 0x8c9   :  { %v919_v46 = vpop.permute.xlu0 %918 }
 0x8ca   :  { %v2479_v43 = vpop.eup %2478  ;;  %v951_v47 = vmul.f32 0.70710677, %v941_v45  ;;  %v929_v49 = vadd.f32 %v919_v46, %v2845_v55  ;;  %v946_v5 = vmul.f32 0.5, %v941_v45 }
 0x8cb   :  { %v958_v48 = vadd.f32 1.0, %v2479_v43 }
 0x8cc   :  { %2484 = verf.f32 %v951_v47  ;;  %v942_v51 = vadd.f32 %v936_v30, %v929_v49 }
 0x8cd   :  { %v963_v52 = vmul.f32 %v958_v48, %v943_v50 }
 0x8ce   :  { %v2481_v53 = vpop.eup %2480  ;;  %v952_v54 = vmul.f32 0.70710677, %v942_v51  ;;  %v947_v7 = vmul.f32 0.5, %v942_v51 }
 0x8cf   :  { %973 = vrot.lane.b32.xlu1 %v963_v52, %s2512_s23  ;;  %v959_v58 = vadd.f32 1.0, %v2481_v53  ;;  %v1088_v52 = vld [vmem:[%s3221_s3 + $0x98] sm:$0xff]  ;;  %v1089_v53 = vld [vmem:[%s3221_s3 + $0xa0] sm:$0xff] }
 0x8d0   :  { %2486 = verf.f32 %v952_v54  ;;  %v2359_v54 = vpack.c.bf16 %v1089_v53, %v1088_v52 }
 0x8d1   :  { %v964_v59 = vmul.f32 %v959_v58, %v944_v57  ;;  %v1090_v57 = vld [vmem:[%s3221_s3 + $0xa8] sm:$0xff]  ;;  %v1091_v58 = vld [vmem:[%s3221_s3 + $0xb0] sm:$0xff] }
 0x8d2   :  { %v2483_v60 = vpop.eup %2482  ;;  %2360 = vmatpush3.bf16.msra.mxu0 %v2359_v54  ;;  %v2996_v54 = vld [vmem:[%s3222_s4 + $0x28] sm:$0xff] }
 0x8d3   :  { %975 = vrot.lane.b32.xlu0 %v964_v59, %s2512_s23  ;;  %v960_v62 = vadd.f32 1.0, %v2483_v60  ;;  %2361 = vmatprep.subr.bf16.mxu0 %v2508_v0  ;;  %v2362_v59 = vpack.c.bf16 %v1091_v58, %v1090_v57  ;;  %v1092_v60 = vld [vmem:[%s3221_s3 + $0xb8] sm:$0xff] }
 0x8d4   :  { %v3001_v57 = vld [vmem:[%s3222_s4 + $0x38] sm:$0xff] }
 0x8d5   :  { %v965_v63 = vmul.f32 %v960_v62, %v945_v61  ;;  %v1093_v61 = vld [vmem:[%s3221_s3 + $0xc0] sm:$0xff] }
 0x8d6   :  { %v2485_v3 = vpop.eup %2484  ;;  %2363 = vmatpush3.bf16.msra.mxu0 %v2362_v59  ;;  %v2365_v62 = vpack.c.bf16 %v1093_v61, %v1092_v60 }
 0x8d7   :  { %977 = vrot.lane.b32.xlu1 %v965_v63, %s2512_s23  ;;  %v961_v6 = vadd.f32 1.0, %v2485_v3  ;;  %2364 = vmatprep.subr.bf16.mxu0 %v2508_v0  ;;  %v1094_v63 = vld [vmem:[%s3221_s3 + $0xc8] sm:$0xff]  ;;  %v1095_v3 = vld [vmem:[%s3221_s3 + $0xd0] sm:$0xff] }
 0x8d9   :  { %v966_v55 = vmul.f32 %v961_v6, %v946_v5  ;;  %v2368_v5 = vpack.c.bf16 %v1095_v3, %v1094_v63  ;;  %v1100_v63 = vld [vmem:[%s3222_s4 + $0x48] sm:$0x3] }
 0x8da   :  { %v2487_v56 = vpop.eup %2486  ;;  %2366 = vmatpush3.bf16.msra.mxu0 %v2365_v62 }
 0x8db   :  { %979 = vrot.lane.b32.xlu0 %v966_v55, %s2512_s23  ;;  %v962_v8 = vadd.f32 1.0, %v2487_v56  ;;  %2367 = vmatprep.subr.bf16.mxu0 %v2508_v0 }
 0x8dd   :  { %v967_v9 = vmul.f32 %v962_v8, %v947_v7 }
 0x8de   :  { %2369 = vmatpush3.bf16.msra.mxu0 %v2368_v5 }
 0x8df   :  { %981 = vrot.lane.b32.xlu1 %v967_v9, %s2512_s23  ;;  %2376 = vmatprep.subr.bf16.mxu0 %v2508_v0 }
 0x941   :  { %v974_v1 = vpop.permute.xlu1 %973 }
 0x942   :  { %989 = vst.msk [vmem:[#allocation2] sm:$0xff] %vm988_vm11, %v974_v1 }
 0x945   :  { %v976_v2 = vpop.permute.xlu0 %975 }
 0x946   :  { %990 = vst.msk [vmem:[#allocation2 + $0x8] sm:$0xff] %vm988_vm11, %v976_v2 }
 0x949   :  { %v978_v10 = vpop.permute.xlu1 %977  ;;  %v995_v11 = vld [vmem:[#allocation2] sm:$0xff] }
 0x94a   :  { %991 = vst.msk [vmem:[#allocation2 + $0x10] sm:$0xff] %vm988_vm11, %v978_v10  ;;  %v1003_v12 = vsel %vm1002_vm12, %v995_v11, 0.0 }
 0x94b   :  { %1004 = vadd.xlane.f32.xlu0 %v1003_v12 }
 0x94d   :  { %v980_v13 = vpop.permute.xlu0 %979  ;;  %v996_v14 = vld [vmem:[#allocation2 + $0x8] sm:$0xff] }
 0x94e   :  { %992 = vst.msk [vmem:[#allocation2 + $0x18] sm:$0xff] %vm988_vm11, %v980_v13  ;;  %v1006_v15 = vsel %vm1002_vm12, %v996_v14, 0.0 }
 0x94f   :  { %1007 = vadd.xlane.f32.xlu1 %v1006_v15 }
 0x951   :  { %v982_v16 = vpop.permute.xlu1 %981  ;;  %v997_v17 = vld [vmem:[#allocation2 + $0x10] sm:$0xff] }
 0x952   :  { %994 = vst.msk [vmem:[#allocation2 + $0x20] sm:$0x3] %vm993_vm13, %v982_v16  ;;  %v1009_v18 = vsel %vm1002_vm12, %v997_v17, 0.0 }
 0x953   :  { %1010 = vadd.xlane.f32.xlu0 %v1009_v18  ;;  %v1898_v18 = vld [vmem:[%s3220_s5 + $0x8] ss:$0 sm:$0xff] }
 0x955   :  { %v998_v19 = vld [vmem:[#allocation2 + $0x18] sm:$0xff] }
 0x956   :  { %v1012_v20 = vsel %vm1002_vm12, %v998_v19, 0.0 }
 0x957   :  { %1013 = vadd.xlane.f32.xlu0 %v1012_v20 }
 0x959   :  { %v999_v22 = vld [vmem:[#allocation2 + $0x20] sm:$0x3] }
 0x95a   :  { %v1016_v26 = vsel %vm1015_vm14, %v999_v22, 0.0 }
 0x95b   :  { %1017 = vadd.xlane.f32.xlu0 %v1016_v26 }
 0x9d8   :  { %v1005_v27 = vpop.xlane.xlu0 %1004 }
 0x9d9   :  { %v1020_v28 = vmul.f32 0.015625, %v1005_v27 }
 0x9db   :  { %v2895_v29 = vsub.f32 %v995_v11, %v1020_v28 }
 0x9dc   :  { %v1008_v30 = vpop.xlane.xlu1 %1007 }
 0x9dd   :  { %v1021_v31 = vmul.f32 0.015625, %v1008_v30  ;;  %v1030_v32 = vmul.f32 %v2895_v29, %v2895_v29 }
 0x9df   :  { %v2899_v33 = vsub.f32 %v996_v14, %v1021_v31  ;;  %v1035_v34 = vsel %vm1002_vm12, %v1030_v32, 0.0  ;;  %v1897_v14 = vld [vmem:[%s3220_s5 + $0x7] ss:$0 sm:$0xff] }
 0x9e0   :  { %1036 = vadd.xlane.f32.xlu1 %v1035_v34  ;;  %v1011_v36 = vpop.xlane.xlu0 %1010 }
 0x9e1   :  { %v1022_v37 = vmul.f32 0.015625, %v1011_v36  ;;  %v1031_v35 = vmul.f32 %v2899_v33, %v2899_v33 }
 0x9e3   :  { %v2904_v38 = vsub.f32 %v997_v17, %v1022_v37  ;;  %v1038_v40 = vsel %vm1002_vm12, %v1031_v35, 0.0 }
 0x9e4   :  { %1039 = vadd.xlane.f32.xlu0 %v1038_v40  ;;  %v1014_v39 = vpop.xlane.xlu0 %1013 }
 0x9e5   :  { %v1023_v41 = vmul.f32 0.015625, %v1014_v39  ;;  %v1032_v42 = vmul.f32 %v2904_v38, %v2904_v38 }
 0x9e7   :  { %v2909_v44 = vsub.f32 %v998_v19, %v1023_v41  ;;  %v1041_v45 = vsel %vm1002_vm12, %v1032_v42, 0.0 }
 0x9e8   :  { %1042 = vadd.xlane.f32.xlu1 %v1041_v45  ;;  %v1018_v46 = vpop.xlane.xlu0 %1017 }
 0x9e9   :  { %v1024_v43 = vmul.f32 0.015625, %v1018_v46  ;;  %v1033_v47 = vmul.f32 %v2909_v44, %v2909_v44  ;;  %v2977_v46 = vld [vmem:[%s3222_s4 + $0x8] sm:$0xff] }
 0x9eb   :  { %v2914_v49 = vsub.f32 %v999_v22, %v1024_v43  ;;  %v1044_v50 = vsel %vm1002_vm12, %v1033_v47, 0.0  ;;  %v2982_v43 = vld [vmem:[%s3222_s4 + $0x18] sm:$0xff] }
 0x9ec   :  { %1045 = vadd.xlane.f32.xlu0 %v1044_v50 }
 0x9ed   :  { %v1034_v48 = vmul.f32 %v2914_v49, %v2914_v49 }
 0x9ef   :  { %v1047_v51 = vsel %vm1015_vm14, %v1034_v48, 0.0 }
 0x9f0   :  { %1048 = vadd.xlane.f32.xlu1 %v1047_v51 }
 0xa6d   :  { %v1037_v6 = vpop.xlane.xlu1 %1036 }
 0xa6e   :  { %v1050_v55 = vmul.f32 0.015625, %v1037_v6 }
 0xa70   :  { %v1055_v56 = vadd.f32 1e-05, %v1050_v55 }
 0xa71   :  { %v1040_v7 = vpop.xlane.xlu0 %1039 }
 0xa72   :  { %2488 = vrsqrt.f32 %v1055_v56  ;;  %v1051_v8 = vmul.f32 0.015625, %v1040_v7 }
 0xa74   :  { %v1056_v9 = vadd.f32 1e-05, %v1051_v8 }
 0xa75   :  { %v1043_v1 = vpop.xlane.xlu1 %1042 }
 0xa76   :  { %2490 = vrsqrt.f32 %v1056_v9  ;;  %v1052_v2 = vmul.f32 0.015625, %v1043_v1 }
 0xa78   :  { %v1057_v10 = vadd.f32 1e-05, %v1052_v2 }
 0xa79   :  { %v1046_v11 = vpop.xlane.xlu0 %1045 }
 0xa7a   :  { %2492 = vrsqrt.f32 %v1057_v10  ;;  %v1053_v12 = vmul.f32 0.015625, %v1046_v11 }
 0xa7c   :  { %v2489_v13 = vpop.eup %2488  ;;  %v1058_v15 = vadd.f32 1e-05, %v1053_v12 }
 0xa7d   :  { %v1065_v16 = vmul.f32 %v2489_v13, %v2895_v29  ;;  %v1049_v17 = vpop.xlane.xlu1 %1048  ;;  %v1417_v13 = vld [vmem:[%s3221_s3 + $0xf0] sm:$0xff] }
 0xa7e   :  { %2494 = vrsqrt.f32 %v1058_v15  ;;  %v1054_v19 = vmul.f32 0.015625, %v1049_v17  ;;  %v1418_v15 = vld [vmem:[%s3221_s3 + $0xf8] sm:$0xff] }
 0xa7f   :  { %v1074_v20 = vmul.f32 %v1897_v14, %v1065_v16  ;;  %v1419_v16 = vld [vmem:[%s3221_s3 + $0x100] sm:$0xff] }
 0xa80   :  { %v2491_v22 = vpop.eup %2490  ;;  %v1059_v26 = vadd.f32 1e-05, %v1054_v19  ;;  %v2383_v17 = vpack.c.bf16 %v1419_v16, %v1418_v15  ;;  %v1421_v19 = vld [vmem:[%s3221_s3 + $0x110] sm:$0xff] }
 0xa81   :  { %v1083_v27 = vadd.f32 %v1898_v18, %v1074_v20  ;;  %v1066_v28 = vmul.f32 %v2491_v22, %v2899_v33  ;;  %v1910_v22 = vld [vmem:[%s3220_s5 + $0x9] ss:$0 sm:$0xff] }
 0xa82   :  { %2496 = vrsqrt.f32 %v1059_v26 }
 0xa83   :  { %2195 = vmatmul.mubr.msk.f32.vlgmr.msra.gmra.mrb[20].mxu0 %vm1002_vm12, %v1083_v27  ;;  %v1075_v30 = vmul.f32 %v1897_v14, %v1066_v28 }
 0xa84   :  { %v2493_v31 = vpop.eup %2492  ;;  %2197 = vmatprep.mubr.msk.f32.mxu0 %vm2510_vm3, %v2511_v4 }
 0xa85   :  { %v1084_v29 = vadd.f32 %v1898_v18, %v1075_v30  ;;  %v1067_v32 = vmul.f32 %v2493_v31, %v2904_v38 }
 0xa87   :  { %2198 = vmatmul.mubr.msk.f32.gmra.mrb[22].mxu0 %vm1002_vm12, %v1084_v29  ;;  %v1076_v34 = vmul.f32 %v1897_v14, %v1067_v32 }
 0xa88   :  { %v2495_v36 = vpop.eup %2494  ;;  %2200 = vmatprep.mubr.msk.f32.mxu0 %vm2510_vm3, %v2511_v4 }
 0xa89   :  { %v1085_v37 = vadd.f32 %v1898_v18, %v1076_v34  ;;  %v1068_v33 = vmul.f32 %v2495_v36, %v2909_v44 }
 0xa8b   :  { %2201 = vmatmul.mubr.msk.f32.gmra.mrb[24].mxu0 %vm1002_vm12, %v1085_v37  ;;  %v1077_v35 = vmul.f32 %v1897_v14, %v1068_v33  ;;  %v1422_v37 = vld [vmem:[%s3221_s3 + $0x118] sm:$0xff]  ;;  %v1423_v33 = vld [vmem:[%s3221_s3 + $0x120] sm:$0xff] }
 0xa8c   :  { %v2497_v40 = vpop.eup %2496  ;;  %2203 = vmatprep.mubr.msk.f32.mxu0 %vm2510_vm3, %v2511_v4 }
 0xa8d   :  { %v1086_v39 = vadd.f32 %v1898_v18, %v1077_v35  ;;  %v1069_v38 = vmul.f32 %v2497_v40, %v2914_v49  ;;  %v2389_v40 = vpack.c.bf16 %v1423_v33, %v1422_v37 }
 0xa8f   :  { %2204 = vmatmul.mubr.msk.f32.gmra.mrb[26].mxu0 %vm1002_vm12, %v1086_v39  ;;  %v1078_v41 = vmul.f32 %v1897_v14, %v1069_v38 }
 0xa90   :  { %2206 = vmatprep.mubr.msk.f32.mxu0 %vm2510_vm3, %v2511_v4 }
 0xa91   :  { %v1087_v42 = vadd.f32 %v1898_v18, %v1078_v41  ;;  %v1420_v18 = vld [vmem:[%s3221_s3 + $0x108] sm:$0xff] }
 0xa92   :  { %v2386_v20 = vpack.c.bf16 %v1421_v19, %v1420_v18 }
 0xa93   :  { %2207 = vmatmul.mubr.msk.f32.gmra.mrb[28].mxu0 %vm1002_vm12, %v1087_v42 }
 0xa94   :  { %2258 = vmatprep.mubr.msk.f32.mxu0 %vm2510_vm3, %v2511_v4 }
 0xb56   :  { %v1183_v44 = vpop.f32.mrb[20].mxu0 }
 0xb57   :  { %v2196_v45 = vpop.f32.mrb[21].mxu0  ;;  %v2985_v49 = vmul.f32 %v1183_v44, %v2977_v46  ;;  %v1424_v44 = vld [vmem:[%s3221_s3 + $0x128] sm:$0xff] }
 0xb58   :  { %v1425_v45 = vld [vmem:[%s3221_s3 + $0x130] sm:$0xff] }
 0xb5a   :  { %v1188_v47 = vpop.f32.mrb[22].mxu0 }
 0xb5b   :  { %v2988_v50 = vmul.f32 %v1188_v47, %v2982_v43  ;;  %v2199_v48 = vpop.f32.mrb[23].mxu0 }
 0xb5d   :  { %v2428_v51 = vpack.i.bf16 %v2988_v50, %v2985_v49 }
 0xb5e   :  { %v1193_v52 = vpop.f32.mrb[24].mxu0 }
 0xb5f   :  { %2429 = vrot.lane.b32.xlu0 %v2428_v51, %s2512_s23  ;;  %v2202_v53 = vpop.f32.mrb[25].mxu0  ;;  %v3004_v59 = vmul.f32 %v1193_v52, %v2996_v54 }
 0xb62   :  { %v1198_v58 = vpop.f32.mrb[26].mxu0 }
 0xb63   :  { %v3007_v60 = vmul.f32 %v1198_v58, %v3001_v57  ;;  %v2205_v61 = vpop.f32.mrb[27].mxu0 }
 0xb65   :  { %v2433_v62 = vpack.i.bf16 %v3007_v60, %v3004_v59 }
 0xb66   :  { %v1203_v3 = vpop.f32.mrb[28].mxu0 }
 0xb67   :  { %2434 = vrot.lane.b32.xlu1 %v2433_v62, %s2512_s23  ;;  %v2208_v5 = vpop.f32.mrb[29].mxu0  ;;  %v3015_v6 = vmul.f32 %v1203_v3, %v1100_v63 }
 0xb6b   :  { %1230 = vrot.lane.b32.xlu1 %v3015_v6, %s2512_s23 }
 0xbd1   :  { %v2430_v55 = vpop.permute.xlu0 %2429 }
 0xbd2   :  { %v2432_v56 = vunpack.i.h.bf16 %v2430_v55  ;;  %v2431_v7 = vunpack.i.l.bf16 %v2430_v55 }
 0xbd4   :  { %v2371_v8 = vpack.c.bf16 %v2432_v56, %v2431_v7 }
 0xbd6   :  { %2372 = vmatpush3.bf16.msra.mxu1 %v2371_v8 }
 0xbd7   :  { %2373 = vmatprep.subr.bf16.mxu1 %v2508_v0 }
 0xbd9   :  { %v2435_v9 = vpop.permute.xlu1 %2434 }
 0xbda   :  { %v2437_v1 = vunpack.i.h.bf16 %v2435_v9  ;;  %v2436_v2 = vunpack.i.l.bf16 %v2435_v9 }
 0xbdc   :  { %v2374_v10 = vpack.c.bf16 %v2437_v1, %v2436_v2 }
 0xbdd   :  { %v1231_v11 = vpop.permute.xlu1 %1230 }
 0xbde   :  { %2375 = vmatpush3.bf16.msra.mxu1 %v2374_v10 }
 0xbdf   :  { %2217 = vmatprep.subr.mxu1 %v2511_v4 }
 0xbe2   :  { %2218 = vmatpush3.msk.msra.mxu1 %vm404_vm7, %v1231_v11 }
 0xbe3   :  { %2220 = vmatmul.mubr.msk.f32.vlgmr.msra.gmra.mrb[30].mxu1 %vm388_vm8, %v2736_v21  ;;  %2394 = vmatprep.subr.bf16.mxu1 %v2508_v0  ;;  %v1216_v21 = vld [vmem:[%s3223_s2 + $0x20] sm:$0x3] }
 0xbe4   :  { %2222 = vmatprep.mubr.msk.f32.mxu1 %vm2510_vm3, %v2511_v4 }
 0xbe7   :  { %2223 = vmatmul.mubr.msk.f32.gmra.mrb[32].mxu1 %vm388_vm8, %v2747_v23  ;;  %v1414_v23 = vld [vmem:[%s3221_s3 + $0xd8] sm:$0xff] }
 0xbe8   :  { %2225 = vmatprep.mubr.msk.f32.mxu1 %vm2510_vm3, %v2511_v4 }
 0xbeb   :  { %2226 = vmatmul.mubr.msk.f32.gmra.mrb[34].mxu1 %vm388_vm8, %v2756_v24  ;;  %v1415_v24 = vld [vmem:[%s3221_s3 + $0xe0] sm:$0xff] }
 0xbec   :  { %2228 = vmatprep.mubr.msk.f32.mxu1 %vm2510_vm3, %v2511_v4  ;;  %v2377_v12 = vpack.c.bf16 %v1415_v24, %v1414_v23 }
 0xbee   :  { %2378 = vmatpush3.bf16.msra.mxu0 %v2377_v12 }
 0xbef   :  { %2229 = vmatmul.mubr.msk.f32.gmra.mrb[36].mxu1 %vm388_vm8, %v2765_v25  ;;  %v1416_v25 = vld [vmem:[%s3221_s3 + $0xe8] sm:$0xff]  ;;  %2379 = vmatprep.subr.bf16.mxu0 %v2508_v0  ;;  %s2515_s3 = smov 61  }
 0xbf0   :  { %2231 = vmatprep.mubr.msk.f32.mxu1 %vm2510_vm3, %v2511_v4  ;;  %v2380_v14 = vpack.c.bf16 %v1417_v13, %v1416_v25 }
 0xbf2   :  { %2381 = vmatpush3.bf16.msra.mxu0 %v2380_v14 }
 0xbf3   :  { %2232 = vmatmul.mubr.msk.f32.gmra.mrb[38].mxu1 %vm388_vm8, %v1216_v21  ;;  %2382 = vmatprep.subr.bf16.mxu0 %v2508_v0 }
 0xbf4   :  { %2283 = vmatprep.mubr.msk.f32.mxu1 %vm2510_vm3, %v2511_v4 }
 0xbf6   :  { %2384 = vmatpush3.bf16.msra.mxu0 %v2383_v17 }
 0xbf7   :  { %2385 = vmatprep.subr.bf16.mxu0 %v2508_v0 }
 0xbfa   :  { %2387 = vmatpush3.bf16.msra.mxu0 %v2386_v20 }
 0xbfb   :  { %2388 = vmatprep.subr.bf16.mxu0 %v2508_v0 }
 0xbfe   :  { %2390 = vmatpush3.bf16.msra.mxu0 %v2389_v40 }
 0xbff   :  { %2391 = vmatprep.subr.bf16.mxu0 %v2508_v0 }
 0xcb6   :  { %v1319_v26 = vpop.f32.mrb[30].mxu1 }
 0xcb7   :  { %v1343_v27 = vadd.f32 %v1319_v26, %v2985_v49  ;;  %v2221_v28 = vpop.f32.mrb[31].mxu1  ;;  %v2392_v49 = vpack.c.bf16 %v1425_v45, %v1424_v44 }
 0xcb9   :  { %v1352_v30 = vadd.f32 %v1910_v22, %v1343_v27  ;;  %2393 = vmatpush3.bf16.msra.mxu0 %v2392_v49 }
 0xcba   :  { %v1324_v31 = vpop.f32.mrb[32].mxu1  ;;  %2298 = vmatprep.subr.mxu0 %v2511_v4 }
 0xcbb   :  { %v1362_v29 = vmul.f32 0.70710677, %v1352_v30  ;;  %v1344_v32 = vadd.f32 %v1324_v31, %v2988_v50  ;;  %v2224_v34 = vpop.f32.mrb[33].mxu1  ;;  %v1357_v63 = vmul.f32 0.5, %v1352_v30 }
 0xcbd   :  { %2498 = verf.f32 %v1362_v29  ;;  %v1353_v36 = vadd.f32 %v1910_v22, %v1344_v32 }
 0xcbe   :  { %v1329_v35 = vpop.f32.mrb[34].mxu1 }
 0xcbf   :  { %v1363_v39 = vmul.f32 0.70710677, %v1353_v36  ;;  %v1345_v38 = vadd.f32 %v1329_v35, %v3004_v59  ;;  %v2227_v41 = vpop.f32.mrb[35].mxu1 }
 0xcc1   :  { %2500 = verf.f32 %v1363_v39  ;;  %v1354_v42 = vadd.f32 %v1910_v22, %v1345_v38 }
 0xcc2   :  { %v1334_v47 = vpop.f32.mrb[36].mxu1 }
 0xcc3   :  { %v1364_v50 = vmul.f32 0.70710677, %v1354_v42  ;;  %v1346_v48 = vadd.f32 %v1334_v47, %v3007_v60  ;;  %v2230_v51 = vpop.f32.mrb[37].mxu1  ;;  %v1358_v60 = vmul.f32 0.5, %v1353_v36  ;;  %v1359_v2 = vmul.f32 0.5, %v1354_v42 }
 0xcc5   :  { %2502 = verf.f32 %v1364_v50  ;;  %v1355_v52 = vadd.f32 %v1910_v22, %v1346_v48 }
 0xcc6   :  { %v1339_v53 = vpop.f32.mrb[38].mxu1 }
 0xcc7   :  { %v2499_v58 = vpop.eup %2498  ;;  %v1365_v59 = vmul.f32 0.70710677, %v1355_v52  ;;  %v1347_v61 = vadd.f32 %v1339_v53, %v3015_v6  ;;  %v2233_v62 = vpop.f32.mrb[39].mxu1  ;;  %v1360_v21 = vmul.f32 0.5, %v1355_v52 }
 0xcc8   :  { %v1372_v3 = vadd.f32 1.0, %v2499_v58 }
 0xcc9   :  { %2504 = verf.f32 %v1365_v59  ;;  %v1356_v5 = vadd.f32 %v1910_v22, %v1347_v61 }
 0xcca   :  { %v1377_v55 = vmul.f32 %v1372_v3, %v1357_v63  ;;  %v1563_v63 = vld [vmem:[%s3223_s2] sm:$0xff] }
 0xccb   :  { %v2501_v56 = vpop.eup %2500  ;;  %v1366_v7 = vmul.f32 0.70710677, %v1356_v5  ;;  %v1361_v12 = vmul.f32 0.5, %v1356_v5  ;;  %v1565_v5 = vld [vmem:[%s3223_s2 + $0x10] sm:$0xff] }
 0xccc   :  { %1387 = vrot.lane.b32.xlu1 %v1377_v55, %s2513_s28  ;;  %v1373_v8 = vadd.f32 1.0, %v2501_v56  ;;  %v1566_v55 = vld [vmem:[%s3223_s2 + $0x18] sm:$0xff]  ;;  %v1567_v56 = vld [vmem:[%s3223_s2 + $0x20] sm:$0x3] }
 0xccd   :  { %2506 = verf.f32 %v1366_v7  ;;  %v1922_v7 = vld [vmem:[%s3220_s5 + $0xa] ss:$0 sm:$0xff] }
 0xcce   :  { %v1378_v9 = vmul.f32 %v1373_v8, %v1358_v60 }
 0xccf   :  { %v2503_v1 = vpop.eup %2502 }
 0xcd0   :  { %1389 = vrot.lane.b32.xlu0 %v1378_v9, %s2513_s28  ;;  %v1374_v10 = vadd.f32 1.0, %v2503_v1 }
 0xcd2   :  { %v1379_v6 = vmul.f32 %v1374_v10, %v1359_v2  ;;  %v1732_v10 = vld [vmem:[%s3220_s5 + $0xb] sm:$0x7] }
 0xcd3   :  { %v2505_v11 = vpop.eup %2504 }
 0xcd4   :  { %1391 = vrot.lane.b32.xlu1 %v1379_v6, %s2513_s28  ;;  %v1375_v23 = vadd.f32 1.0, %v2505_v11 }
 0xcd6   :  { %v1380_v24 = vmul.f32 %v1375_v23, %v1360_v21 }
 0xcd7   :  { %v2507_v25 = vpop.eup %2506 }
 0xcd8   :  { %1393 = vrot.lane.b32.xlu0 %v1380_v24, %s2513_s28  ;;  %v1376_v13 = vadd.f32 1.0, %v2507_v25 }
 0xcda   :  { %v1381_v14 = vmul.f32 %v1376_v13, %v1361_v12 }
 0xcdc   :  { %1395 = vrot.lane.b32.xlu1 %v1381_v14, %s2513_s28 }
 0xd3e   :  { %v1388_v15 = vpop.permute.xlu1 %1387 }
 0xd3f   :  { %1403 = vst.msk [vmem:[#allocation2] sm:$0xff] %vm1402_vm15, %v1388_v15 }
 0xd42   :  { %v1390_v16 = vpop.permute.xlu0 %1389 }
 0xd43   :  { %1404 = vst.msk [vmem:[#allocation2 + $0x8] sm:$0xff] %vm1402_vm15, %v1390_v16 }
 0xd46   :  { %v1392_v17 = vpop.permute.xlu1 %1391  ;;  %v1409_v18 = vld [vmem:[#allocation2] sm:$0xff] }
 0xd47   :  { %1405 = vst.msk [vmem:[#allocation2 + $0x10] sm:$0xff] %vm1402_vm15, %v1392_v17  ;;  %2259 = vmatmul.mubr.msk.f32.vlgmr.msra.gmra.mrb[30].mxu0 %vm1432_vm0, %v1409_v18 }
 0xd48   :  { %2261 = vmatprep.mubr.msk.f32.mxu0 %vm2510_vm3, %v2511_v4  ;;  %2299 = vmatpush3.msk.msra.mxu0 %vm1759_vm2, %v1732_v10 }
 0xd4a   :  { %v1394_v19 = vpop.permute.xlu0 %1393  ;;  %v1410_v20 = vld [vmem:[#allocation2 + $0x8] sm:$0xff] }
 0xd4b   :  { %1406 = vst.msk [vmem:[#allocation2 + $0x18] sm:$0xff] %vm1402_vm15, %v1394_v19  ;;  %2262 = vmatmul.mubr.msk.f32.gmra.mrb[32].mxu0 %vm1432_vm0, %v1410_v20 }
 0xd4c   :  { %2264 = vmatprep.mubr.msk.f32.mxu0 %vm2510_vm3, %v2511_v4 }
 0xd4e   :  { %v1396_v22 = vpop.permute.xlu1 %1395  ;;  %v1411_v26 = vld [vmem:[#allocation2 + $0x10] sm:$0xff] }
 0xd4f   :  { %1408 = vst.msk [vmem:[#allocation2 + $0x20] sm:$0x3] %vm1407_vm1, %v1396_v22  ;;  %2265 = vmatmul.mubr.msk.f32.gmra.mrb[34].mxu0 %vm1432_vm0, %v1411_v26 }
 0xd50   :  { %2267 = vmatprep.mubr.msk.f32.mxu0 %vm2510_vm3, %v2511_v4 }
 0xd52   :  { %v1412_v27 = vld [vmem:[#allocation2 + $0x18] sm:$0xff] }
 0xd53   :  { %2268 = vmatmul.mubr.msk.f32.gmra.mrb[36].mxu0 %vm1432_vm0, %v1412_v27 }
 0xd54   :  { %2270 = vmatprep.mubr.msk.f32.mxu0 %vm2510_vm3, %v2511_v4 }
 0xd56   :  { %v1413_v28 = vld [vmem:[#allocation2 + $0x20] sm:$0x3] }
 0xd57   :  { %2271 = vmatmul.mubr.msk.f32.gmra.mrb[38].mxu0 %vm1432_vm0, %v1413_v28 }
 0xd58   :  { %2300 = vmatprep.mubr.msk.f32.mxu0 %vm2510_vm3, %v2511_v4 }
 0xe1a   :  { %v1514_v30 = vpop.f32.mrb[30].mxu0 }
 0xe1b   :  { %v2260_v31 = vpop.f32.mrb[31].mxu0  ;;  %1543 = vrot.lane.b32.xlu0 %v1514_v30, %s2513_s28 }
 0xe1e   :  { %v1519_v29 = vpop.f32.mrb[32].mxu0 }
 0xe1f   :  { %v2263_v32 = vpop.f32.mrb[33].mxu0  ;;  %1545 = vrot.lane.b32.xlu1 %v1519_v29, %s2513_s28 }
 0xe22   :  { %v1524_v34 = vpop.f32.mrb[34].mxu0 }
 0xe23   :  { %v2266_v36 = vpop.f32.mrb[35].mxu0  ;;  %1547 = vrot.lane.b32.xlu0 %v1524_v34, %s2513_s28 }
 0xe26   :  { %v1529_v37 = vpop.f32.mrb[36].mxu0 }
 0xe27   :  { %v2269_v33 = vpop.f32.mrb[37].mxu0  ;;  %1549 = vrot.lane.b32.xlu1 %v1529_v37, %s2513_s28 }
 0xe2a   :  { %v1534_v35 = vpop.f32.mrb[38].mxu0 }
 0xe2b   :  { %1551 = vrot.lane.b32.xlu0 %v1534_v35, %s2513_s28  ;;  %v2272_v40 = vpop.f32.mrb[39].mxu0 }
 0xe8d   :  { %v1544_v39 = vpop.permute.xlu0 %1543 }
 0xe8e   :  { %v3121_v41 = vmul.f32 %v1544_v39, %v2977_v46  ;;  %v1430_v46 = vld [vmem:[%s3222_s4 + $0x48] sm:$0x3] }
 0xe91   :  { %v1546_v38 = vpop.permute.xlu1 %1545 }
 0xe92   :  { %v3124_v42 = vmul.f32 %v1546_v38, %v2982_v43 }
 0xe94   :  { %v2438_v44 = vpack.i.bf16 %v3124_v42, %v3121_v41 }
 0xe95   :  { %v1548_v45 = vpop.permute.xlu0 %1547 }
 0xe96   :  { %2439 = vrot.lane.b32.xlu1 %v2438_v44, %s2515_s3  ;;  %v3129_v49 = vmul.f32 %v1548_v45, %v2996_v54 }
 0xe99   :  { %v1550_v47 = vpop.permute.xlu1 %1549 }
 0xe9a   :  { %v3132_v50 = vmul.f32 %v1550_v47, %v3001_v57 }
 0xe9c   :  { %v2443_v43 = vpack.i.bf16 %v3132_v50, %v3129_v49 }
 0xe9d   :  { %v1552_v48 = vpop.permute.xlu0 %1551 }
 0xe9e   :  { %v3139_v51 = vmul.f32 %v1552_v48, %v1430_v46  ;;  %2444 = vrot.lane.b32.xlu0 %v2443_v43, %s2515_s3 }
 0xea0   :  { %1581 = vrot.lane.b32.xlu1 %v3139_v51, %s2515_s3 }
 0xea4   :  { %1724 = vrot.lane.b32.xlu1 %v1922_v7, %s2513_s28 }
 0xf08   :  { %v2440_v52 = vpop.permute.xlu1 %2439 }
 0xf09   :  { %v2442_v53 = vunpack.i.h.bf16 %v2440_v52  ;;  %v2441_v54 = vunpack.i.l.bf16 %v2440_v52 }
 0xf0b   :  { %v2395_v58 = vpack.c.bf16 %v2442_v53, %v2441_v54 }
 0xf0d   :  { %2396 = vmatpush3.bf16.msra.mxu1 %v2395_v58 }
 0xf0e   :  { %2397 = vmatprep.subr.bf16.mxu1 %v2508_v0  ;;  %v1564_v0 = vld [vmem:[%s3223_s2 + $0x8] sm:$0xff] }
 0xf10   :  { %v2445_v57 = vpop.permute.xlu0 %2444 }
 0xf11   :  { %v2447_v59 = vunpack.i.h.bf16 %v2445_v57  ;;  %v2446_v61 = vunpack.i.l.bf16 %v2445_v57 }
 0xf12   :  { %v1582_v3 = vpop.permute.xlu1 %1581 }
 0xf13   :  { %v2398_v62 = vpack.c.bf16 %v2447_v59, %v2446_v61 }
 0xf15   :  { %2399 = vmatpush3.bf16.msra.mxu1 %v2398_v62 }
 0xf16   :  { %2281 = vmatprep.subr.mxu1 %v2511_v4  ;;  %v1725_v12 = vpop.permute.xlu1 %1724 }
 0xf19   :  { %2282 = vmatpush3.msk.msra.mxu1 %vm404_vm7, %v1582_v3 }
 0xf1a   :  { %2284 = vmatmul.mubr.msk.f32.vlgmr.msra.gmra.mrb[40].mxu1 %vm388_vm8, %v1563_v63 }
 0xf1b   :  { %2286 = vmatprep.mubr.msk.f32.mxu1 %vm2510_vm3, %v2511_v4 }
 0xf1e   :  { %2287 = vmatmul.mubr.msk.f32.gmra.mrb[42].mxu1 %vm388_vm8, %v1564_v0 }
 0xf1f   :  { %2289 = vmatprep.mubr.msk.f32.mxu1 %vm2510_vm3, %v2511_v4 }
 0xf22   :  { %2290 = vmatmul.mubr.msk.f32.gmra.mrb[44].mxu1 %vm388_vm8, %v1565_v5 }
 0xf23   :  { %2292 = vmatprep.mubr.msk.f32.mxu1 %vm2510_vm3, %v2511_v4 }
 0xf26   :  { %2293 = vmatmul.mubr.msk.f32.gmra.mrb[46].mxu1 %vm388_vm8, %v1566_v55 }
 0xf27   :  { %2295 = vmatprep.mubr.msk.f32.mxu1 %vm2510_vm3, %v2511_v4 }
 0xf2a   :  { %2296 = vmatmul.mubr.msk.f32.gmra.mrb[48].mxu1 %vm388_vm8, %v1567_v56 }
 0xfed   :  { %v1670_v60 = vpop.f32.mrb[40].mxu1 }
 0xfee   :  { %1699 = vrot.lane.b32.xlu0 %v1670_v60, %s2513_s28  ;;  %v2285_v8 = vpop.f32.mrb[41].mxu1 }
 0xff1   :  { %v1675_v9 = vpop.f32.mrb[42].mxu1 }
 0xff2   :  { %1701 = vrot.lane.b32.xlu0 %v1675_v9, %s2513_s28  ;;  %v2288_v1 = vpop.f32.mrb[43].mxu1 }
 0xff5   :  { %v1680_v2 = vpop.f32.mrb[44].mxu1 }
 0xff6   :  { %1703 = vrot.lane.b32.xlu1 %v1680_v2, %s2513_s28  ;;  %v2291_v6 = vpop.f32.mrb[45].mxu1 }
 0xff9   :  { %v1685_v11 = vpop.f32.mrb[46].mxu1 }
 0xffa   :  { %1705 = vrot.lane.b32.xlu0 %v1685_v11, %s2513_s28  ;;  %v2294_v21 = vpop.f32.mrb[47].mxu1 }
 0xffd   :  { %v1690_v23 = vpop.f32.mrb[48].mxu1 }
 0xffe   :  { %1707 = vrot.lane.b32.xlu1 %v1690_v23, %s2513_s28  ;;  %v2297_v24 = vpop.f32.mrb[49].mxu1 }
0x1060   :  { %v1700_v25 = vpop.permute.xlu0 %1699 }
0x1061   :  { %v1714_v13 = vadd.f32 %v1700_v25, %v3121_v41 }
0x1063   :  { %v1727_v14 = vadd.f32 %v1725_v12, %v1714_v13 }
0x1064   :  { %v1702_v15 = vpop.permute.xlu0 %1701 }
0x1065   :  { %v1715_v16 = vadd.f32 %v1702_v15, %v3124_v42  ;;  %1738 = vrot.lane.b32.xlu0 %v1727_v14, %s2513_s28 }
0x1067   :  { %v1728_v17 = vadd.f32 %v1725_v12, %v1715_v16 }
0x1068   :  { %v1704_v18 = vpop.permute.xlu1 %1703 }
0x1069   :  { %v1716_v19 = vadd.f32 %v1704_v18, %v3129_v49  ;;  %1740 = vrot.lane.b32.xlu1 %v1728_v17, %s2513_s28 }
0x106b   :  { %v1729_v20 = vadd.f32 %v1725_v12, %v1716_v19 }
0x106c   :  { %v1706_v22 = vpop.permute.xlu0 %1705 }
0x106d   :  { %v1717_v26 = vadd.f32 %v1706_v22, %v3132_v50  ;;  %1742 = vrot.lane.b32.xlu0 %v1729_v20, %s2513_s28 }
0x106f   :  { %v1730_v27 = vadd.f32 %v1725_v12, %v1717_v26 }
0x1070   :  { %v1708_v28 = vpop.permute.xlu1 %1707 }
0x1071   :  { %v1718_v30 = vadd.f32 %v1708_v28, %v3139_v51  ;;  %1744 = vrot.lane.b32.xlu1 %v1730_v27, %s2513_s28 }
0x1073   :  { %v1731_v31 = vadd.f32 %v1725_v12, %v1718_v30 }
0x1075   :  { %1746 = vrot.lane.b32.xlu0 %v1731_v31, %s2513_s28 }
0x10d7   :  { %v1739_v29 = vpop.permute.xlu0 %1738 }
0x10d8   :  { %2301 = vmatmul.mubr.msk.f32.vlgmr.msra.gmra.mrb[40].mxu0 %vm1748_vm4, %v1739_v29 }
0x10d9   :  { %2303 = vmatprep.mubr.msk.f32.mxu0 %vm2510_vm3, %v2511_v4 }
0x10db   :  { %v1741_v32 = vpop.permute.xlu1 %1740 }
0x10dc   :  { %2304 = vmatmul.mubr.msk.f32.gmra.mrb[42].mxu0 %vm1748_vm4, %v1741_v32 }
0x10dd   :  { %2306 = vmatprep.mubr.msk.f32.mxu0 %vm2510_vm3, %v2511_v4 }
0x10df   :  { %v1743_v34 = vpop.permute.xlu0 %1742 }
0x10e0   :  { %2307 = vmatmul.mubr.msk.f32.gmra.mrb[44].mxu0 %vm1748_vm4, %v1743_v34 }
0x10e1   :  { %2309 = vmatprep.mubr.msk.f32.mxu0 %vm2510_vm3, %v2511_v4 }
0x10e3   :  { %v1745_v36 = vpop.permute.xlu1 %1744 }
0x10e4   :  { %2310 = vmatmul.mubr.msk.f32.gmra.mrb[46].mxu0 %vm1748_vm4, %v1745_v36 }
0x10e5   :  { %2312 = vmatprep.mubr.msk.f32.mxu0 %vm2510_vm3, %v2511_v4 }
0x10e7   :  { %v1747_v37 = vpop.permute.xlu0 %1746 }
0x10e8   :  { %2313 = vmatmul.mubr.msk.f32.gmra.mrb[48].mxu0 %vm1748_vm4, %v1747_v37 }
0x11ab   :  { %v1829_v33 = vpop.f32.mrb[40].mxu0 }
0x11ac   :  { %1853 = vst [vmem:[%s3224_s6] sm:$0xff] %v1829_v33  ;;  %v2302_v35 = vpop.f32.mrb[41].mxu0 }
0x11af   :  { %v1834_v40 = vpop.f32.mrb[42].mxu0 }
0x11b0   :  { %1854 = vst [vmem:[%s3224_s6 + $0x8] sm:$0xff] %v1834_v40  ;;  %v2305_v39 = vpop.f32.mrb[43].mxu0 }
0x11b3   :  { %v1839_v38 = vpop.f32.mrb[44].mxu0 }
0x11b4   :  { %1855 = vst [vmem:[%s3224_s6 + $0x10] sm:$0xff] %v1839_v38  ;;  %v2308_v4 = vpop.f32.mrb[45].mxu0 }
0x11b7   :  { %v1844_v41 = vpop.f32.mrb[46].mxu0 }
0x11b8   :  { %1856 = vst [vmem:[%s3224_s6 + $0x18] sm:$0xff] %v1844_v41  ;;  %v2311_v42 = vpop.f32.mrb[47].mxu0 }
0x11bb   :  { %v1849_v44 = vpop.f32.mrb[48].mxu0 }
0x11bc   :  { %1857 = vst [vmem:[%s3224_s6 + $0x20] sm:$0x3] %v1849_v44  ;;  %v2314_v45 = vpop.f32.mrb[49].mxu0 }

</bundles_post_ra>
